<compile_context>
chip_gen: v7x
topology: tpu7x:2x2x1
jax: 0.10.0
libtpu: 0.0.40
codegen_flags: <defaults>
</compile_context>

<pallas_src>
import functools

import jax
import jax.numpy as jnp
from jax import lax
from jax.experimental import pallas as pl
from jax.experimental.pallas import tpu as pltpu

LANE = 128        # lane padding for feature/hidden/class dims
BLK = 256         # row/col tile of the adjacency (256-aligned for v6e/v7x MXU)


def _round_up(v, m):
    return ((v + m - 1) // m) * m


def _pad2(a, rows, cols):
    r, c = a.shape
    return jnp.pad(a, ((0, rows - r), (0, cols - c)))


def _mosaic_params(semantics, buffer_bytes):
    # Explicit VMEM budget: double-buffered blocks + 2x headroom, clamped to
    # stay within physical VMEM on every generation (v7x has only 64 MiB).
    need = 2 * int(sum(buffer_bytes))
    limit = int(min(64 * 2**20, max(2 * need, 32 * 2**20)))
    return pltpu.CompilerParams(dimension_semantics=semantics,
                                vmem_limit_bytes=limit)


# ----------------------------------------------------------------------------
# Kernels
# ----------------------------------------------------------------------------
def _gin_layer_kernel(a_ref, x_ref, scale_ref, shift_ref,
                      w1_ref, b1_ref, w2_ref, b2_ref,
                      h_ref, stats_ref, acc_ref, *, n_real, tm):
    """One GIN layer, tiled over (row tiles, adjacency-K tiles).

    acc += A[i,k] @ (x[k] * scale + shift)        (previous layer's BN folded in)
    at k == last:  h = relu( relu(acc @ w1 + b1) @ w2 + b2 ), masked to real
                   rows; also emit per-tile sum / sum-of-squares for BN stats.
    """
    i = pl.program_id(0)
    k = pl.program_id(1)

    @pl.when(k == 0)
    def _():
        acc_ref[...] = jnp.zeros_like(acc_ref)

    # Fold the previous layer's BatchNorm (affine scale/shift) into the load.
    x = x_ref[...] * scale_ref[...] + shift_ref[...]
    a = a_ref[...].astype(jnp.float32)            # bf16 in HBM, f32 on the MXU
    acc_ref[...] += jnp.dot(a, x, preferred_element_type=jnp.float32)

    @pl.when(k == pl.num_programs(1) - 1)
    def _():
        z = acc_ref[...]
        h = jnp.dot(z, w1_ref[...], preferred_element_type=jnp.float32) + b1_ref[...]
        h = jnp.maximum(h, 0.0)
        h = jnp.dot(h, w2_ref[...], preferred_element_type=jnp.float32) + b2_ref[...]
        h = jnp.maximum(h, 0.0)                    # outer F.relu

        # Zero out padded node rows so BN statistics stay exact.
        row = i * tm + lax.broadcasted_iota(jnp.int32, h.shape, 0)
        h = jnp.where(row < n_real, h, 0.0)
        h_ref[...] = h

        # Partial BatchNorm statistics for this row tile (finished in glue).
        ssum = jnp.sum(h, axis=0, keepdims=True)           # (1, Hp)
        ssq = jnp.sum(h * h, axis=0, keepdims=True)        # (1, Hp)
        pad = jnp.zeros((6, h.shape[1]), jnp.float32)
        stats_ref[...] = jnp.concatenate([ssum, ssq, pad], axis=0)[None]


def _head_kernel(x_ref, scale_ref, shift_ref, w1_ref, b1_ref, w2_ref, b2_ref,
                 o_ref, *, n_classes):
    """BN(prev layer) -> fc1 -> ReLU -> fc2 -> log_softmax over real classes."""
    x = x_ref[...] * scale_ref[...] + shift_ref[...]
    h = jnp.dot(x, w1_ref[...], preferred_element_type=jnp.float32) + b1_ref[...]
    h = jnp.maximum(h, 0.0)
    logits = jnp.dot(h, w2_ref[...], preferred_element_type=jnp.float32) + b2_ref[...]
    # Mask padded class lanes out of the softmax.
    col = lax.broadcasted_iota(jnp.int32, logits.shape, 1)
    logits = jnp.where(col < n_classes, logits, -1e30)
    m = jnp.max(logits, axis=-1, keepdims=True)
    s = logits - m
    lse = jnp.log(jnp.sum(jnp.exp(s), axis=-1, keepdims=True))
    o_ref[...] = s - lse


# ----------------------------------------------------------------------------
# Wrappers
# ----------------------------------------------------------------------------
def gin_layer(adj, x, scale, shift, w1, b1, w2, b2, *, n_real, blk):
    np_, _ = adj.shape
    fp = x.shape[1]
    hp = w1.shape[1]
    n_row = np_ // blk
    n_k = np_ // blk

    kernel = functools.partial(_gin_layer_kernel, n_real=n_real, tm=blk)
    buffers = (blk * blk * 2, blk * fp * 4, fp * 4, fp * 4,
               fp * hp * 4, hp * 4, hp * hp * 4, hp * 4,
               blk * hp * 4, 8 * hp * 4, blk * fp * 4)

    grid_spec = pltpu.PrefetchScalarGridSpec(
        num_scalar_prefetch=0,
        grid=(n_row, n_k),
        in_specs=[
            pl.BlockSpec((blk, blk), lambda i, k: (i, k)),    # A (bf16, streamed)
            pl.BlockSpec((blk, fp), lambda i, k: (k, 0)),     # x
            pl.BlockSpec((1, fp), lambda i, k: (0, 0)),       # BN scale (prev)
            pl.BlockSpec((1, fp), lambda i, k: (0, 0)),       # BN shift (prev)
            pl.BlockSpec((fp, hp), lambda i, k: (0, 0)),      # w1
            pl.BlockSpec((1, hp), lambda i, k: (0, 0)),       # b1
            pl.BlockSpec((hp, hp), lambda i, k: (0, 0)),      # w2
            pl.BlockSpec((1, hp), lambda i, k: (0, 0)),       # b2
        ],
        out_specs=(
            pl.BlockSpec((blk, hp), lambda i, k: (i, 0)),     # h (pre-BN)
            pl.BlockSpec((1, 8, hp), lambda i, k: (i, 0, 0)),  # partial BN stats
        ),
        scratch_shapes=[pltpu.VMEM((blk, fp), jnp.float32)],
    )
    return pl.pallas_call(
        kernel,
        out_shape=(jax.ShapeDtypeStruct((np_, hp), jnp.float32),
                   jax.ShapeDtypeStruct((n_row, 8, hp), jnp.float32)),
        grid_spec=grid_spec,
        compiler_params=_mosaic_params(("parallel", "arbitrary"), buffers),
    )(adj, x, scale, shift, w1, b1, w2, b2)


def gin_head(x, scale, shift, w1, b1, w2, b2, *, n_classes, blk):
    np_, hp = x.shape
    cp = w2.shape[1]
    n_row = np_ // blk

    kernel = functools.partial(_head_kernel, n_classes=n_classes)
    buffers = (blk * hp * 4, hp * 4, hp * 4, hp * hp * 4, hp * 4,
               hp * cp * 4, cp * 4, blk * cp * 4)

    grid_spec = pltpu.PrefetchScalarGridSpec(
        num_scalar_prefetch=0,
        grid=(n_row,),
        in_specs=[
            pl.BlockSpec((blk, hp), lambda i: (i, 0)),
            pl.BlockSpec((1, hp), lambda i: (0, 0)),
            pl.BlockSpec((1, hp), lambda i: (0, 0)),
            pl.BlockSpec((hp, hp), lambda i: (0, 0)),
            pl.BlockSpec((1, hp), lambda i: (0, 0)),
            pl.BlockSpec((hp, cp), lambda i: (0, 0)),
            pl.BlockSpec((1, cp), lambda i: (0, 0)),
        ],
        out_specs=pl.BlockSpec((blk, cp), lambda i: (i, 0)),
    )
    return pl.pallas_call(
        kernel,
        out_shape=jax.ShapeDtypeStruct((np_, cp), jnp.float32),
        grid_spec=grid_spec,
        compiler_params=_mosaic_params(("parallel",), buffers),
    )(x, scale, shift, w1, b1, w2, b2)


@functools.partial(jax.jit, static_argnames=("num_nodes",))
def gin_forward(features, edge_index, params, num_nodes):
    """Full GIN forward. features: [N, F] f32, edge_index: [2, E] int32."""
    n = num_nodes
    f = features.shape[1]
    hdim = params["conv_layers"][0]["w1"].shape[1]
    c = params["fc2_w"].shape[1]

    np_ = _round_up(n, BLK)
    fp = _round_up(f, LANE)
    hp = _round_up(hdim, LANE)
    cp = _round_up(c, LANE)

    # Glue: dense adjacency A[i,j] = #edges j->i with self loops folded in
    # (A + I, eps = 0).  bf16 halves HBM bytes for the dominant N^2 operand;
    # edge multiplicities <= 256 are exact in bf16.
    # TODO(synk): for genuinely sparse / huge graphs replace the dense A @ x
    # with an edge-tiled gather + segment-sum kernel (PrefetchScalarGridSpec).
    src, dst = edge_index[0], edge_index[1]
    adj = jnp.zeros((np_, np_), jnp.float32).at[dst, src].add(1.0)
    diag = jnp.arange(n)
    adj = adj.at[diag, diag].add(1.0)
    adj = adj.astype(jnp.bfloat16)

    x = _pad2(features.astype(jnp.float32), np_, fp)
    # BN of the "previous layer" folded into each kernel's load: identity first.
    scale = jnp.ones((1, fp), jnp.float32)
    shift = jnp.zeros((1, fp), jnp.float32)

    for layer in params["conv_layers"]:
        in_p = x.shape[1]
        w1 = _pad2(layer["w1"], in_p, hp)
        b1 = _pad2(layer["b1"], 1, hp)
        w2 = _pad2(layer["w2"], hp, hp)
        b2 = _pad2(layer["b2"], 1, hp)

        h, stats = gin_layer(adj, x, scale, shift, w1, b1, w2, b2,
                             n_real=n, blk=BLK)

        # Finalize BatchNorm statistics (training mode, biased variance) from
        # the per-tile partial sums; fold into an affine (scale, shift) that the
        # NEXT kernel applies on load -> no extra HBM round trip of h.
        ssum = jnp.sum(stats[:, 0, :], axis=0)
        ssq = jnp.sum(stats[:, 1, :], axis=0)
        mean = ssum / n
        var = jnp.maximum(ssq / n - mean * mean, 0.0)
        inv = lax.rsqrt(var + 1e-5)
        gamma = _pad2(layer["gamma"], 1, hp)
        beta = _pad2(layer["beta"], 1, hp)
        scale = gamma * inv[None, :]
        shift = beta - mean[None, :] * scale
        x = h

    fc1_w = _pad2(params["fc1_w"], hp, hp)
    fc1_b = _pad2(params["fc1_b"], 1, hp)
    fc2_w = _pad2(params["fc2_w"], hp, cp)
    fc2_b = _pad2(params["fc2_b"], 1, cp)
    out = gin_head(x, scale, shift, fc1_w, fc1_b, fc2_w, fc2_b,
                   n_classes=c, blk=BLK)
    return out[:n, :c]


# ----------------------------------------------------------------------------
# Pure-JAX reference (for correctness check) and parameter construction
# ----------------------------------------------------------------------------
def _gin_reference(features, edge_index, params, num_nodes):
    src, dst = edge_index[0], edge_index[1]
    a = jnp.zeros((num_nodes, num_nodes), jnp.float32).at[dst, src].add(1.0)
    x = features
    for layer in params["conv_layers"]:
        z = x + a @ x
        h = jnp.maximum(z @ layer["w1"] + layer["b1"], 0.0)
        h = h @ layer["w2"] + layer["b2"]
        h = jnp.maximum(h, 0.0)
        mu = jnp.mean(h, axis=0, keepdims=True)
        var = jnp.mean((h - mu) ** 2, axis=0, keepdims=True)
        x = layer["gamma"] * (h - mu) * lax.rsqrt(var + 1e-5) + layer["beta"]
    h = jnp.maximum(x @ params["fc1_w"] + params["fc1_b"], 0.0)
    logits = h @ params["fc2_w"] + params["fc2_b"]
    return jax.nn.log_softmax(logits, axis=-1)


def _linear_init(key, fan_in, fan_out):
    kw, kb = jax.random.split(key)
    bound = 1.0 / jnp.sqrt(fan_in)
    w = jax.random.uniform(kw, (fan_in, fan_out), jnp.float32, -bound, bound)
    b = jax.random.uniform(kb, (1, fan_out), jnp.float32, -bound, bound)
    return w, b


def make_params(key, in_feats, n_hidden, n_classes, n_layers):
    n_conv = n_layers - 1  # 1 initial conv + (n_layers - 2) more
    keys = jax.random.split(key, 2 * n_conv + 2)
    conv_layers = []
    fin = in_feats
    for i in range(n_conv):
        w1, b1 = _linear_init(keys[2 * i], fin, n_hidden)
        w2, b2 = _linear_init(keys[2 * i + 1], n_hidden, n_hidden)
        conv_layers.append(dict(
            w1=w1, b1=b1, w2=w2, b2=b2,
            gamma=jnp.ones((1, n_hidden), jnp.float32),
            beta=jnp.zeros((1, n_hidden), jnp.float32),
        ))
        fin = n_hidden
    fc1_w, fc1_b = _linear_init(keys[-2], n_hidden, n_hidden)
    fc2_w, fc2_b = _linear_init(keys[-1], n_hidden, n_classes)
    return dict(conv_layers=conv_layers,
                fc1_w=fc1_w, fc1_b=fc1_b, fc2_w=fc2_w, fc2_b=fc2_b)


# ----------------------------------------------------------------------------
if __name__ == "__main__":
    N_NODES, IN_FEATS, N_HIDDEN, N_CLASSES, N_LAYERS = 32, 16, 32, 8, 3
    N_EDGES = 64

    root = jax.random.PRNGKey(0)
    k_feat, k_edge, k_param = jax.random.split(root, 3)

    features = jax.random.normal(k_feat, (N_NODES, IN_FEATS), jnp.float32)
    edge_index = jax.random.randint(k_edge, (2, N_EDGES), 0, N_NODES, jnp.int32)
    params = make_params(k_param, IN_FEATS, N_HIDDEN, N_CLASSES, N_LAYERS)

    out = gin_forward(features, edge_index, params, num_nodes=N_NODES)
    jax.block_until_ready(out)

    assert out.shape == (N_NODES, N_CLASSES)
    # log_softmax rows must sum (in prob space) to 1
    assert jnp.allclose(jnp.sum(jnp.exp(out), axis=-1), 1.0, atol=1e-4)
    # match the pure-JAX reference
    ref = _gin_reference(features, edge_index, params, N_NODES)
    max_err = float(jnp.max(jnp.abs(out - ref)))
    assert max_err < 2e-2, f"mismatch vs reference: {max_err}"
    print("KERNEL_OK")
</pallas_src>

<mosaic_0001>
module attributes {stable_mosaic.version = 11 : i64} {
  func.func private @main(%arg0: i32) attributes {dimension_semantics = [#tpu.dimension_semantics<core_parallel>], iteration_bounds = array<i64: 2>, tpu.core_type = #tpu.core_type<sc_scalar_subcore>, window_params = []} {
    return
  }
}

module attributes {stable_mosaic.version = 11 : i64} {
  func.func private @main(%arg0: i32) attributes {dimension_semantics = [#tpu.dimension_semantics<core_parallel>], iteration_bounds = array<i64: 2>, tpu.core_type = #tpu.core_type<sc_scalar_subcore>, window_params = []} {
    return
  }
}

module attributes {stable_mosaic.version = 11 : i64} {
  func.func @_head_kernel(%arg0: i32, %arg1: memref<256x128xf32, #tpu.memory_space<vmem>>, %arg2: memref<1x128xf32, #tpu.memory_space<vmem>>, %arg3: memref<1x128xf32, #tpu.memory_space<vmem>>, %arg4: memref<128x128xf32, #tpu.memory_space<vmem>>, %arg5: memref<1x128xf32, #tpu.memory_space<vmem>>, %arg6: memref<128x128xf32, #tpu.memory_space<vmem>>, %arg7: memref<1x128xf32, #tpu.memory_space<vmem>>, %arg8: memref<256x128xf32, #tpu.memory_space<vmem>>) attributes {dimension_semantics = [#tpu.dimension_semantics<parallel>], iteration_bounds = array<i64: 1>, scalar_prefetch = 0 : i64, scratch_operands = 0 : i64, tpu.core_type = #tpu.core_type<tc>, window_params = [{transform_indices = @transform_0, window_bounds = array<i64: 256, 128>}, {pipeline_mode = #tpu.pipeline_mode<synchronous>, transform_indices = @transform_1, window_bounds = array<i64: 1, 128>}, {pipeline_mode = #tpu.pipeline_mode<synchronous>, transform_indices = @transform_2, window_bounds = array<i64: 1, 128>}, {pipeline_mode = #tpu.pipeline_mode<synchronous>, transform_indices = @transform_3, window_bounds = array<i64: 128, 128>}, {pipeline_mode = #tpu.pipeline_mode<synchronous>, transform_indices = @transform_4, window_bounds = array<i64: 1, 128>}, {pipeline_mode = #tpu.pipeline_mode<synchronous>, transform_indices = @transform_5, window_bounds = array<i64: 128, 128>}, {pipeline_mode = #tpu.pipeline_mode<synchronous>, transform_indices = @transform_6, window_bounds = array<i64: 1, 128>}, {transform_indices = @transform_7, window_bounds = array<i64: 256, 128>}]} {
    %c0 = arith.constant 0 : index
    %c0_0 = arith.constant 0 : index
    %0 = vector.load %arg1[%c0, %c0_0] : memref<256x128xf32, #tpu.memory_space<vmem>>, vector<256x128xf32>
    %c0_1 = arith.constant 0 : index
    %c0_2 = arith.constant 0 : index
    %1 = vector.load %arg2[%c0_1, %c0_2] : memref<1x128xf32, #tpu.memory_space<vmem>>, vector<1x128xf32>
    %2 = vector.broadcast %1 : vector<1x128xf32> to vector<256x128xf32>
    %3 = arith.mulf %0, %2 : vector<256x128xf32>
    %c0_3 = arith.constant 0 : index
    %c0_4 = arith.constant 0 : index
    %4 = vector.load %arg3[%c0_3, %c0_4] : memref<1x128xf32, #tpu.memory_space<vmem>>, vector<1x128xf32>
    %5 = vector.broadcast %4 : vector<1x128xf32> to vector<256x128xf32>
    %6 = arith.addf %3, %5 : vector<256x128xf32>
    %c0_5 = arith.constant 0 : index
    %c0_6 = arith.constant 0 : index
    %7 = vector.load %arg4[%c0_5, %c0_6] : memref<128x128xf32, #tpu.memory_space<vmem>>, vector<128x128xf32>
    %cst = arith.constant dense<0.000000e+00> : vector<256x128xf32>
    %8 = tpu.matmul %6, %7, %cst {dimension_numbers = #tpu.dot_dimension_numbers<[1], [0], [0], [1], [0, 0, 1, 1], [], []>} : vector<256x128xf32>, vector<128x128xf32>, vector<256x128xf32> -> vector<256x128xf32>
    %c0_7 = arith.constant 0 : index
    %c0_8 = arith.constant 0 : index
    %9 = vector.load %arg5[%c0_7, %c0_8] : memref<1x128xf32, #tpu.memory_space<vmem>>, vector<1x128xf32>
    %10 = vector.broadcast %9 : vector<1x128xf32> to vector<256x128xf32>
    %11 = arith.addf %8, %10 : vector<256x128xf32>
    %cst_9 = arith.constant 0.000000e+00 : f32
    %12 = vector.broadcast %cst_9 : f32 to vector<256x128xf32>
    %13 = arith.maximumf %11, %12 : vector<256x128xf32>
    %c0_10 = arith.constant 0 : index
    %c0_11 = arith.constant 0 : index
    %14 = vector.load %arg6[%c0_10, %c0_11] : memref<128x128xf32, #tpu.memory_space<vmem>>, vector<128x128xf32>
    %cst_12 = arith.constant dense<0.000000e+00> : vector<256x128xf32>
    %15 = tpu.matmul %13, %14, %cst_12 {dimension_numbers = #tpu.dot_dimension_numbers<[1], [0], [0], [1], [0, 0, 1, 1], [], []>} : vector<256x128xf32>, vector<128x128xf32>, vector<256x128xf32> -> vector<256x128xf32>
    %c0_13 = arith.constant 0 : index
    %c0_14 = arith.constant 0 : index
    %16 = vector.load %arg7[%c0_13, %c0_14] : memref<1x128xf32, #tpu.memory_space<vmem>>, vector<1x128xf32>
    %17 = vector.broadcast %16 : vector<1x128xf32> to vector<256x128xf32>
    %18 = arith.addf %15, %17 : vector<256x128xf32>
    %19 = tpu.iota {dimensions = array<i32: 1>} : vector<256x128xi32>
    %c8_i32 = arith.constant 8 : i32
    %20 = vector.broadcast %c8_i32 : i32 to vector<256x128xi32>
    %21 = arith.cmpi slt, %19, %20 : vector<256x128xi32>
    %cst_15 = arith.constant -1.000000e+30 : f32
    %22 = vector.broadcast %cst_15 : f32 to vector<256x128xf32>
    %23 = arith.select %21, %18, %22 : vector<256x128xi1>, vector<256x128xf32>
    %cst_16 = arith.constant dense<0xFF800000> : vector<256xf32>
    %24 = vector.multi_reduction <maximumf>, %23, %cst_16 [1] : vector<256x128xf32> to vector<256xf32>
    %25 = vector.shape_cast %24 : vector<256xf32> to vector<256x1xf32>
    %26 = vector.broadcast %25 : vector<256x1xf32> to vector<256x128xf32>
    %27 = arith.subf %23, %26 : vector<256x128xf32>
    %28 = math.exp %27 : vector<256x128xf32>
    %cst_17 = arith.constant dense<0.000000e+00> : vector<256xf32>
    %29 = vector.multi_reduction <add>, %28, %cst_17 [1] : vector<256x128xf32> to vector<256xf32>
    %30 = vector.shape_cast %29 : vector<256xf32> to vector<256x1xf32>
    %31 = math.log %30 : vector<256x1xf32>
    %32 = vector.broadcast %31 : vector<256x1xf32> to vector<256x128xf32>
    %33 = arith.subf %27, %32 : vector<256x128xf32>
    %c0_18 = arith.constant 0 : index
    %c0_19 = arith.constant 0 : index
    %34 = vector.load %arg8[%c0_18, %c0_19] : memref<256x128xf32, #tpu.memory_space<vmem>>, vector<256x128xf32>
    tpu.vector_store %arg8[%c0_18, %c0_19], %33 {strides = array<i32>} : memref<256x128xf32, #tpu.memory_space<vmem>>, vector<256x128xf32>,
    return
  }
  func.func @transform_0(%arg0: i32) -> (i32, i32) {
    %c0_i32 = arith.constant 0 : i32
    %c0_i32_0 = arith.constant 0 : i32
    return %arg0, %c0_i32 : i32, i32
  }
  func.func @transform_1(%arg0: i32) -> (i32, i32) {
    %c0_i32 = arith.constant 0 : i32
    %c0_i32_0 = arith.constant 0 : i32
    %c0_i32_1 = arith.constant 0 : i32
    return %c0_i32, %c0_i32_0 : i32, i32
  }
  func.func @transform_2(%arg0: i32) -> (i32, i32) {
    %c0_i32 = arith.constant 0 : i32
    %c0_i32_0 = arith.constant 0 : i32
    %c0_i32_1 = arith.constant 0 : i32
    return %c0_i32, %c0_i32_0 : i32, i32
  }
  func.func @transform_3(%arg0: i32) -> (i32, i32) {
    %c0_i32 = arith.constant 0 : i32
    %c0_i32_0 = arith.constant 0 : i32
    %c0_i32_1 = arith.constant 0 : i32
    return %c0_i32, %c0_i32_0 : i32, i32
  }
  func.func @transform_4(%arg0: i32) -> (i32, i32) {
    %c0_i32 = arith.constant 0 : i32
    %c0_i32_0 = arith.constant 0 : i32
    %c0_i32_1 = arith.constant 0 : i32
    return %c0_i32, %c0_i32_0 : i32, i32
  }
  func.func @transform_5(%arg0: i32) -> (i32, i32) {
    %c0_i32 = arith.constant 0 : i32
    %c0_i32_0 = arith.constant 0 : i32
    %c0_i32_1 = arith.constant 0 : i32
    return %c0_i32, %c0_i32_0 : i32, i32
  }
  func.func @transform_6(%arg0: i32) -> (i32, i32) {
    %c0_i32 = arith.constant 0 : i32
    %c0_i32_0 = arith.constant 0 : i32
    %c0_i32_1 = arith.constant 0 : i32
    return %c0_i32, %c0_i32_0 : i32, i32
  }
  func.func @transform_7(%arg0: i32) -> (i32, i32) {
    %c0_i32 = arith.constant 0 : i32
    %c0_i32_0 = arith.constant 0 : i32
    return %arg0, %c0_i32 : i32, i32
  }
}

module attributes {stable_mosaic.version = 11 : i64} {
  func.func @_gin_layer_kernel(%arg0: i32, %arg1: i32, %arg2: memref<256x256xbf16, #tpu.memory_space<vmem>>, %arg3: memref<256x128xf32, #tpu.memory_space<vmem>>, %arg4: memref<1x128xf32, #tpu.memory_space<vmem>>, %arg5: memref<1x128xf32, #tpu.memory_space<vmem>>, %arg6: memref<128x128xf32, #tpu.memory_space<vmem>>, %arg7: memref<1x128xf32, #tpu.memory_space<vmem>>, %arg8: memref<128x128xf32, #tpu.memory_space<vmem>>, %arg9: memref<1x128xf32, #tpu.memory_space<vmem>>, %arg10: memref<256x128xf32, #tpu.memory_space<vmem>>, %arg11: memref<1x8x128xf32, #tpu.memory_space<vmem>>, %arg12: memref<256x128xf32, #tpu.memory_space<vmem>>) attributes {dimension_semantics = [#tpu.dimension_semantics<parallel>, #tpu.dimension_semantics<arbitrary>], iteration_bounds = array<i64: 1, 1>, scalar_prefetch = 0 : i64, scratch_operands = 1 : i64, tpu.core_type = #tpu.core_type<tc>, window_params = [{transform_indices = @transform_0, window_bounds = array<i64: 256, 256>}, {transform_indices = @transform_1, window_bounds = array<i64: 256, 128>}, {pipeline_mode = #tpu.pipeline_mode<synchronous>, transform_indices = @transform_2, window_bounds = array<i64: 1, 128>}, {pipeline_mode = #tpu.pipeline_mode<synchronous>, transform_indices = @transform_3, window_bounds = array<i64: 1, 128>}, {pipeline_mode = #tpu.pipeline_mode<synchronous>, transform_indices = @transform_4, window_bounds = array<i64: 128, 128>}, {pipeline_mode = #tpu.pipeline_mode<synchronous>, transform_indices = @transform_5, window_bounds = array<i64: 1, 128>}, {pipeline_mode = #tpu.pipeline_mode<synchronous>, transform_indices = @transform_6, window_bounds = array<i64: 128, 128>}, {pipeline_mode = #tpu.pipeline_mode<synchronous>, transform_indices = @transform_7, window_bounds = array<i64: 1, 128>}, {transform_indices = @transform_8, window_bounds = array<i64: 256, 128>}, {transform_indices = @transform_9, window_bounds = array<i64: 1, 8, 128>}]} {
    %c0_i32 = arith.constant 0 : i32
    %0 = arith.cmpi eq, %arg1, %c0_i32 : i32
    %1 = arith.extui %0 : i1 to i32
    %c0_i32_0 = arith.constant 0 : i32
    %2 = arith.cmpi ne, %1, %c0_i32_0 : i32
    scf.if %2 {
      %cst_14 = arith.constant 0.000000e+00 : f32
      %19 = vector.broadcast %cst_14 : f32 to vector<256x128xf32>
      %c0_15 = arith.constant 0 : index
      %c0_16 = arith.constant 0 : index
      %20 = vector.load %arg12[%c0_15, %c0_16] : memref<256x128xf32, #tpu.memory_space<vmem>>, vector<256x128xf32>
      tpu.vector_store %arg12[%c0_15, %c0_16], %19 {strides = array<i32>} : memref<256x128xf32, #tpu.memory_space<vmem>>, vector<256x128xf32>,
    } else {
    }
    %c0 = arith.constant 0 : index
    %c0_1 = arith.constant 0 : index
    %3 = vector.load %arg3[%c0, %c0_1] : memref<256x128xf32, #tpu.memory_space<vmem>>, vector<256x128xf32>
    %c0_2 = arith.constant 0 : index
    %c0_3 = arith.constant 0 : index
    %4 = vector.load %arg4[%c0_2, %c0_3] : memref<1x128xf32, #tpu.memory_space<vmem>>, vector<1x128xf32>
    %5 = vector.broadcast %4 : vector<1x128xf32> to vector<256x128xf32>
    %6 = arith.mulf %3, %5 : vector<256x128xf32>
    %c0_4 = arith.constant 0 : index
    %c0_5 = arith.constant 0 : index
    %7 = vector.load %arg5[%c0_4, %c0_5] : memref<1x128xf32, #tpu.memory_space<vmem>>, vector<1x128xf32>
    %8 = vector.broadcast %7 : vector<1x128xf32> to vector<256x128xf32>
    %9 = arith.addf %6, %8 : vector<256x128xf32>
    %c0_6 = arith.constant 0 : index
    %c0_7 = arith.constant 0 : index
    %10 = vector.load %arg2[%c0_6, %c0_7] : memref<256x256xbf16, #tpu.memory_space<vmem>>, vector<256x256xbf16>
    %11 = arith.extf %10 : vector<256x256xbf16> to vector<256x256xf32>
    %c0_8 = arith.constant 0 : index
    %c0_9 = arith.constant 0 : index
    %12 = vector.load %arg12[%c0_8, %c0_9] : memref<256x128xf32, #tpu.memory_space<vmem>>, vector<256x128xf32>
    %cst = arith.constant dense<0.000000e+00> : vector<256x128xf32>
    %13 = tpu.matmul %11, %9, %cst {dimension_numbers = #tpu.dot_dimension_numbers<[1], [0], [0], [1], [0, 0, 1, 1], [], []>} : vector<256x256xf32>, vector<256x128xf32>, vector<256x128xf32> -> vector<256x128xf32>
    %14 = arith.addf %12, %13 : vector<256x128xf32>
    %c0_10 = arith.constant 0 : index
    %c0_11 = arith.constant 0 : index
    %15 = vector.load %arg12[%c0_10, %c0_11] : memref<256x128xf32, #tpu.memory_space<vmem>>, vector<256x128xf32>
    tpu.vector_store %arg12[%c0_10, %c0_11], %14 {strides = array<i32>} : memref<256x128xf32, #tpu.memory_space<vmem>>, vector<256x128xf32>,
    %c0_i32_12 = arith.constant 0 : i32
    %16 = arith.cmpi eq, %arg1, %c0_i32_12 : i32
    %17 = arith.extui %16 : i1 to i32
    %c0_i32_13 = arith.constant 0 : i32
    %18 = arith.cmpi ne, %17, %c0_i32_13 : i32
    scf.if %18 {
      %c0_14 = arith.constant 0 : index
      %c0_15 = arith.constant 0 : index
      %19 = vector.load %arg12[%c0_14, %c0_15] : memref<256x128xf32, #tpu.memory_space<vmem>>, vector<256x128xf32>
      %c0_16 = arith.constant 0 : index
      %c0_17 = arith.constant 0 : index
      %20 = vector.load %arg6[%c0_16, %c0_17] : memref<128x128xf32, #tpu.memory_space<vmem>>, vector<128x128xf32>
      %cst_18 = arith.constant dense<0.000000e+00> : vector<256x128xf32>
      %21 = tpu.matmul %19, %20, %cst_18 {dimension_numbers = #tpu.dot_dimension_numbers<[1], [0], [0], [1], [0, 0, 1, 1], [], []>} : vector<256x128xf32>, vector<128x128xf32>, vector<256x128xf32> -> vector<256x128xf32>
      %c0_19 = arith.constant 0 : index
      %c0_20 = arith.constant 0 : index
      %22 = vector.load %arg7[%c0_19, %c0_20] : memref<1x128xf32, #tpu.memory_space<vmem>>, vector<1x128xf32>
      %23 = vector.broadcast %22 : vector<1x128xf32> to vector<256x128xf32>
      %24 = arith.addf %21, %23 : vector<256x128xf32>
      %cst_21 = arith.constant 0.000000e+00 : f32
      %25 = vector.broadcast %cst_21 : f32 to vector<256x128xf32>
      %26 = arith.maximumf %24, %25 : vector<256x128xf32>
      %c0_22 = arith.constant 0 : index
      %c0_23 = arith.constant 0 : index
      %27 = vector.load %arg8[%c0_22, %c0_23] : memref<128x128xf32, #tpu.memory_space<vmem>>, vector<128x128xf32>
      %cst_24 = arith.constant dense<0.000000e+00> : vector<256x128xf32>
      %28 = tpu.matmul %26, %27, %cst_24 {dimension_numbers = #tpu.dot_dimension_numbers<[1], [0], [0], [1], [0, 0, 1, 1], [], []>} : vector<256x128xf32>, vector<128x128xf32>, vector<256x128xf32> -> vector<256x128xf32>
      %c0_25 = arith.constant 0 : index
      %c0_26 = arith.constant 0 : index
      %29 = vector.load %arg9[%c0_25, %c0_26] : memref<1x128xf32, #tpu.memory_space<vmem>>, vector<1x128xf32>
      %30 = vector.broadcast %29 : vector<1x128xf32> to vector<256x128xf32>
      %31 = arith.addf %28, %30 : vector<256x128xf32>
      %cst_27 = arith.constant 0.000000e+00 : f32
      %32 = vector.broadcast %cst_27 : f32 to vector<256x128xf32>
      %33 = arith.maximumf %31, %32 : vector<256x128xf32>
      %c256_i32 = arith.constant 256 : i32
      %34 = arith.muli %arg0, %c256_i32 : i32
      %35 = tpu.iota {dimensions = array<i32: 0>} : vector<256x128xi32>
      %36 = vector.broadcast %34 : i32 to vector<256x128xi32>
      %37 = arith.addi %36, %35 : vector<256x128xi32>
      %c32_i32 = arith.constant 32 : i32
      %38 = vector.broadcast %c32_i32 : i32 to vector<256x128xi32>
      %39 = arith.cmpi slt, %37, %38 : vector<256x128xi32>
      %cst_28 = arith.constant 0.000000e+00 : f32
      %40 = vector.broadcast %cst_28 : f32 to vector<256x128xf32>
      %41 = arith.select %39, %33, %40 : vector<256x128xi1>, vector<256x128xf32>
      %c0_29 = arith.constant 0 : index
      %c0_30 = arith.constant 0 : index
      %42 = vector.load %arg10[%c0_29, %c0_30] : memref<256x128xf32, #tpu.memory_space<vmem>>, vector<256x128xf32>
      tpu.vector_store %arg10[%c0_29, %c0_30], %41 {strides = array<i32>} : memref<256x128xf32, #tpu.memory_space<vmem>>, vector<256x128xf32>,
      %cst_31 = arith.constant dense<0.000000e+00> : vector<128xf32>
      %43 = vector.multi_reduction <add>, %41, %cst_31 [0] : vector<256x128xf32> to vector<128xf32>
      %44 = vector.shape_cast %43 : vector<128xf32> to vector<1x128xf32>
      %45 = arith.mulf %41, %41 : vector<256x128xf32>
      %cst_32 = arith.constant dense<0.000000e+00> : vector<128xf32>
      %46 = vector.multi_reduction <add>, %45, %cst_32 [0] : vector<256x128xf32> to vector<128xf32>
      %47 = vector.shape_cast %46 : vector<128xf32> to vector<1x128xf32>
      %cst_33 = arith.constant 0.000000e+00 : f32
      %48 = vector.broadcast %cst_33 : f32 to vector<6x128xf32>
      %49 = tpu.concatenate %44, %47, %48 in 0 : vector<1x128xf32>, vector<1x128xf32>, vector<6x128xf32> -> vector<8x128xf32>
      %50 = vector.shape_cast %49 : vector<8x128xf32> to vector<1x8x128xf32>
      %c0_34 = arith.constant 0 : index
      %c0_35 = arith.constant 0 : index
      %c0_36 = arith.constant 0 : index
      %51 = vector.load %arg11[%c0_34, %c0_35, %c0_36] : memref<1x8x128xf32, #tpu.memory_space<vmem>>, vector<1x8x128xf32>
      tpu.vector_store %arg11[%c0_34, %c0_35, %c0_36], %50 {strides = array<i32>} : memref<1x8x128xf32, #tpu.memory_space<vmem>>, vector<1x8x128xf32>,
    } else {
    }
    return
  }
  func.func @transform_0(%arg0: i32, %arg1: i32) -> (i32, i32) {
    %c0_i32 = arith.constant 0 : i32
    return %arg0, %arg1 : i32, i32
  }
  func.func @transform_1(%arg0: i32, %arg1: i32) -> (i32, i32) {
    %c0_i32 = arith.constant 0 : i32
    %c0_i32_0 = arith.constant 0 : i32
    return %arg1, %c0_i32 : i32, i32
  }
  func.func @transform_2(%arg0: i32, %arg1: i32) -> (i32, i32) {
    %c0_i32 = arith.constant 0 : i32
    %c0_i32_0 = arith.constant 0 : i32
    %c0_i32_1 = arith.constant 0 : i32
    return %c0_i32, %c0_i32_0 : i32, i32
  }
  func.func @transform_3(%arg0: i32, %arg1: i32) -> (i32, i32) {
    %c0_i32 = arith.constant 0 : i32
    %c0_i32_0 = arith.constant 0 : i32
    %c0_i32_1 = arith.constant 0 : i32
    return %c0_i32, %c0_i32_0 : i32, i32
  }
  func.func @transform_4(%arg0: i32, %arg1: i32) -> (i32, i32) {
    %c0_i32 = arith.constant 0 : i32
    %c0_i32_0 = arith.constant 0 : i32
    %c0_i32_1 = arith.constant 0 : i32
    return %c0_i32, %c0_i32_0 : i32, i32
  }
  func.func @transform_5(%arg0: i32, %arg1: i32) -> (i32, i32) {
    %c0_i32 = arith.constant 0 : i32
    %c0_i32_0 = arith.constant 0 : i32
    %c0_i32_1 = arith.constant 0 : i32
    return %c0_i32, %c0_i32_0 : i32, i32
  }
  func.func @transform_6(%arg0: i32, %arg1: i32) -> (i32, i32) {
    %c0_i32 = arith.constant 0 : i32
    %c0_i32_0 = arith.constant 0 : i32
    %c0_i32_1 = arith.constant 0 : i32
    return %c0_i32, %c0_i32_0 : i32, i32
  }
  func.func @transform_7(%arg0: i32, %arg1: i32) -> (i32, i32) {
    %c0_i32 = arith.constant 0 : i32
    %c0_i32_0 = arith.constant 0 : i32
    %c0_i32_1 = arith.constant 0 : i32
    return %c0_i32, %c0_i32_0 : i32, i32
  }
  func.func @transform_8(%arg0: i32, %arg1: i32) -> (i32, i32) {
    %c0_i32 = arith.constant 0 : i32
    %c0_i32_0 = arith.constant 0 : i32
    return %arg0, %c0_i32 : i32, i32
  }
  func.func @transform_9(%arg0: i32, %arg1: i32) -> (i32, i32, i32) {
    %c0_i32 = arith.constant 0 : i32
    %c0_i32_0 = arith.constant 0 : i32
    %c0_i32_1 = arith.constant 0 : i32
    return %arg0, %c0_i32, %c0_i32_0 : i32, i32, i32
  }
}

</mosaic_0001>

<bundles_post_ra>
// kernel: gin_forward.5
= control target key start
LH: loop header
LB: loop body
LE: loop exit
PB: predicated region body
PF: predicated region fallthrough
CT: control target
= control target key end

     0   :  { %s2339_s3 = inlined_call_operand.vmem [shape: f32[128,128], index: 3, kind: input, shape index: {}]   ;;  %s2340_s0 = inlined_call_operand.vmem [shape: f32[256,128], index: 0, kind: input, shape index: {}]   ;;  %s2341_s1 = inlined_call_operand.vmem [shape: f32[1,128], index: 1, kind: input, shape index: {}]   ;;  %s2342_s2 = inlined_call_operand.vmem [shape: f32[1,128], index: 2, kind: input, shape index: {}]   ;;  %s2343_s5 = inlined_call_operand.vmem [shape: f32[128,128], index: 5, kind: input, shape index: {}]   ;;  %s2344_s4 = inlined_call_operand.vmem [shape: f32[1,128], index: 4, kind: input, shape index: {}]   ;;  %s2345_s6 = inlined_call_operand.vmem [shape: f32[1,128], index: 6, kind: input, shape index: {}]   ;;  %s2346_s7 = inlined_call_operand.vmem [shape: f32[256,128], index: 7, kind: output, shape index: {}]  }
   0x1   :  { %v136_v0 = vld [vmem:[%s2339_s3] sm:$0xff]  ;;  %v137_v1 = vld [vmem:[%s2339_s3 + $0x8] sm:$0xff]  ;;  %v138_v2 = vld [vmem:[%s2339_s3 + $0x10] sm:$0xff] }
   0x2   :  { %v1315_v3 = vpack.c.bf16 %v137_v1, %v136_v0  ;;  %v139_v4 = vld [vmem:[%s2339_s3 + $0x18] sm:$0xff]  ;;  %v140_v6 = vld [vmem:[%s2339_s3 + $0x20] sm:$0xff]  ;;  %v141_v7 = vld [vmem:[%s2339_s3 + $0x28] sm:$0xff] }
   0x3   :  { %v1319_v5 = vpack.c.bf16 %v139_v4, %v138_v2  ;;  %v1323_v8 = vpack.c.bf16 %v141_v7, %v140_v6  ;;  %v26_v9 = vld [vmem:[%s2340_s0] sm:$0xff]  ;;  %v142_v11 = vld [vmem:[%s2339_s3 + $0x30] sm:$0xff]  ;;  %v143_v12 = vld [vmem:[%s2339_s3 + $0x38] sm:$0xff] }
   0x4   :  { %1316 = vmatprep.subr.bf16.mxu0 %v1315_v3  ;;  %v1571_v10 = vld [vmem:[%s2341_s1] ss:$0 sm:$0xff]  ;;  %v1327_v16 = vpack.c.bf16 %v143_v12, %v142_v11  ;;  %v145_v18 = vld [vmem:[%s2339_s3 + $0x48] sm:$0xff]  ;;  %v146_v20 = vld [vmem:[%s2339_s3 + $0x50] sm:$0xff] }
   0x5   :  { %1318 = vmatpush3.bf16.msra.mxu0 %v1315_v3  ;;  %v65_v13 = vmul.f32 %v1571_v10, %v26_v9  ;;  %v1583_v14 = vld [vmem:[%s2342_s2] ss:$0 sm:$0xff]  ;;  %v47_v21 = vld [vmem:[%s2340_s0 + $0xa8] sm:$0xff]  ;;  %v147_v22 = vld [vmem:[%s2339_s3 + $0x58] sm:$0xff] }
   0x6   :  { %1320 = vmatprep.subr.bf16.mxu0 %v1319_v5  ;;  %v144_v17 = vld [vmem:[%s2339_s3 + $0x40] sm:$0xff]  ;;  %v48_v23 = vld [vmem:[%s2340_s0 + $0xb0] sm:$0xff]  ;;  %v49_v24 = vld [vmem:[%s2340_s0 + $0xb8] sm:$0xff]  ;;  %v86_v28 = vmul.f32 %v1571_v10, %v47_v21  ;;  %v1335_v31 = vpack.c.bf16 %v147_v22, %v146_v20 }
   0x7   :  { %v104_v15 = vadd.f32 %v1583_v14, %v65_v13  ;;  %v1331_v19 = vpack.c.bf16 %v145_v18, %v144_v17  ;;  %v148_v25 = vld [vmem:[%s2339_s3 + $0x60] sm:$0xff]  ;;  %v149_v26 = vld [vmem:[%s2339_s3 + $0x68] sm:$0xff]  ;;  %v52_v30 = vld [vmem:[%s2340_s0 + $0xd0] sm:$0xff]  ;;  %v87_v32 = vmul.f32 %v1571_v10, %v48_v23  ;;  %v88_v33 = vmul.f32 %v1571_v10, %v49_v24 }
   0x8   :  { %v50_v27 = vld [vmem:[%s2340_s0 + $0xc0] sm:$0xff]  ;;  %v51_v29 = vld [vmem:[%s2340_s0 + $0xc8] sm:$0xff]  ;;  %v53_v34 = vld [vmem:[%s2340_s0 + $0xd8] sm:$0xff]  ;;  %v1339_v37 = vpack.c.bf16 %v149_v26, %v148_v25  ;;  %v1635_v38 = vadd.f32 %v1583_v14, %v86_v28  ;;  %v91_v45 = vmul.f32 %v1571_v10, %v52_v30 }
   0x9   :  { %1322 = vmatpush3.bf16.msra.mxu0 %v1319_v5  ;;  %1187 = vmatprep.mubr.f32.mxu0 %v104_v15  ;;  %v54_v35 = vld [vmem:[%s2340_s0 + $0xe0] sm:$0xff]  ;;  %v55_v36 = vld [vmem:[%s2340_s0 + $0xe8] sm:$0xff]  ;;  %v89_v39 = vmul.f32 %v1571_v10, %v50_v27  ;;  %v56_v40 = vld [vmem:[%s2340_s0 + $0xf0] sm:$0xff]  ;;  %v1645_v42 = vadd.f32 %v1583_v14, %v87_v32  ;;  %v1648_v43 = vadd.f32 %v1583_v14, %v88_v33 }
   0xa   :  { %1324 = vmatprep.subr.bf16.mxu0 %v1323_v8  ;;  %v57_v41 = vld [vmem:[%s2340_s0 + $0xf8] sm:$0xff]  ;;  %v90_v44 = vmul.f32 %v1571_v10, %v51_v29  ;;  %v416_v46 = vld [vmem:[%s2343_s5] sm:$0xff]  ;;  %v417_v47 = vld [vmem:[%s2343_s5 + $0x8] sm:$0xff]  ;;  %v92_v49 = vmul.f32 %v1571_v10, %v53_v34  ;;  %v93_v50 = vmul.f32 %v1571_v10, %v54_v35  ;;  %v94_v51 = vmul.f32 %v1571_v10, %v55_v36 }
   0xb   :  { %v1659_v48 = vadd.f32 %v1583_v14, %v89_v39  ;;  %v418_v52 = vld [vmem:[%s2343_s5 + $0x10] sm:$0xff]  ;;  %v419_v53 = vld [vmem:[%s2343_s5 + $0x18] sm:$0xff]  ;;  %v1674_v55 = vadd.f32 %v1583_v14, %v91_v45  ;;  %v95_v56 = vmul.f32 %v1571_v10, %v56_v40  ;;  %v96_v57 = vmul.f32 %v1571_v10, %v57_v41  ;;  %v420_v3 = vld [vmem:[%s2343_s5 + $0x20] sm:$0xff] }
   0xc   :  { %v1671_v54 = vadd.f32 %v1583_v14, %v90_v44  ;;  %v150_v58 = vld [vmem:[%s2339_s3 + $0x70] sm:$0xff]  ;;  %v151_v59 = vld [vmem:[%s2339_s3 + $0x78] sm:$0xff]  ;;  %v1685_v60 = vadd.f32 %v1583_v14, %v92_v49  ;;  %v1688_v61 = vadd.f32 %v1583_v14, %v93_v50  ;;  %v1691_v62 = vadd.f32 %v1583_v14, %v94_v51  ;;  %v421_v4 = vld [vmem:[%s2343_s5 + $0x28] sm:$0xff] }
   0xd   :  { %1326 = vmatpush3.bf16.msra.mxu0 %v1323_v8  ;;  %v1347_v63 = vpack.c.bf16 %v417_v47, %v416_v46  ;;  %v1694_v0 = vadd.f32 %v1583_v14, %v95_v56  ;;  %v1697_v1 = vadd.f32 %v1583_v14, %v96_v57  ;;  %v1351_v2 = vpack.c.bf16 %v419_v53, %v418_v52  ;;  %v27_v5 = vld [vmem:[%s2340_s0 + $0x8] sm:$0xff]  ;;  %v28_v7 = vld [vmem:[%s2340_s0 + $0x10] sm:$0xff]  ;;  %v423_v12 = vld [vmem:[%s2343_s5 + $0x38] sm:$0xff] }
   0xe   :  { %1328 = vmatprep.subr.bf16.mxu0 %v1327_v16  ;;  %v1343_v6 = vpack.c.bf16 %v151_v59, %v150_v58  ;;  %v1355_v8 = vpack.c.bf16 %v421_v4, %v420_v3  ;;  %v66_v9 = vmul.f32 %v1571_v10, %v27_v5  ;;  %v422_v11 = vld [vmem:[%s2343_s5 + $0x30] sm:$0xff]  ;;  %v67_v13 = vmul.f32 %v1571_v10, %v28_v7  ;;  %v29_v15 = vld [vmem:[%s2340_s0 + $0x18] sm:$0xff]  ;;  %v424_v20 = vld [vmem:[%s2343_s5 + $0x40] sm:$0xff] }
   0xf   :  { %1348 = vmatprep.subr.bf16.mxu1 %v1347_v63  ;;  %v1359_v17 = vpack.c.bf16 %v423_v12, %v422_v11  ;;  %v425_v21 = vld [vmem:[%s2343_s5 + $0x48] sm:$0xff]  ;;  %v32_v25 = vld [vmem:[%s2340_s0 + $0x30] sm:$0xff]  ;;  %v427_v30 = vld [vmem:[%s2343_s5 + $0x58] sm:$0xff] }
  0x10   :  { %1350 = vmatpush3.bf16.msra.mxu1 %v1347_v63  ;;  %v105_v18 = vadd.f32 %v1583_v14, %v66_v9  ;;  %v106_v22 = vadd.f32 %v1583_v14, %v67_v13  ;;  %v31_v24 = vld [vmem:[%s2340_s0 + $0x28] sm:$0xff]  ;;  %v1363_v26 = vpack.c.bf16 %v425_v21, %v424_v20  ;;  %v426_v29 = vld [vmem:[%s2343_s5 + $0x50] sm:$0xff]  ;;  %v71_v32 = vmul.f32 %v1571_v10, %v32_v25  ;;  %v33_v33 = vld [vmem:[%s2340_s0 + $0x38] sm:$0xff] }
  0x11   :  { %1330 = vmatpush3.bf16.msra.mxu0 %v1327_v16  ;;  %1352 = vmatprep.subr.bf16.mxu1 %v1351_v2  ;;  %v30_v16 = vld [vmem:[%s2340_s0 + $0x20] sm:$0xff]  ;;  %v70_v28 = vmul.f32 %v1571_v10, %v31_v24  ;;  %v1367_v35 = vpack.c.bf16 %v427_v30, %v426_v29  ;;  %v429_v40 = vld [vmem:[%s2343_s5 + $0x68] sm:$0xff]  ;;  %v36_v46 = vld [vmem:[%s2340_s0 + $0x50] sm:$0xff] }
  0x12   :  { %1332 = vmatprep.subr.bf16.mxu0 %v1331_v19  ;;  %v69_v23 = vmul.f32 %v1571_v10, %v30_v16  ;;  %v34_v34 = vld [vmem:[%s2340_s0 + $0x40] sm:$0xff]  ;;  %v110_v41 = vadd.f32 %v1583_v14, %v71_v32  ;;  %v35_v45 = vld [vmem:[%s2340_s0 + $0x48] sm:$0xff]  ;;  %v75_v52 = vmul.f32 %v1571_v10, %v36_v46  ;;  %v37_v53 = vld [vmem:[%s2340_s0 + $0x58] sm:$0xff] }
  0x13   :  { %v109_v36 = vadd.f32 %v1583_v14, %v70_v28  ;;  %v428_v39 = vld [vmem:[%s2343_s5 + $0x60] sm:$0xff]  ;;  %v73_v44 = vmul.f32 %v1571_v10, %v34_v34  ;;  %v74_v50 = vmul.f32 %v1571_v10, %v35_v45  ;;  %v76_v58 = vmul.f32 %v1571_v10, %v37_v53  ;;  %v40_v3 = vld [vmem:[%s2340_s0 + $0x70] sm:$0xff]  ;;  %v43_v16 = vld [vmem:[%s2340_s0 + $0x88] sm:$0xff] }
  0x14   :  { %1354 = vmatpush3.bf16.msra.mxu1 %v1351_v2  ;;  %v1371_v47 = vpack.c.bf16 %v429_v40, %v428_v39  ;;  %v38_v56 = vld [vmem:[%s2340_s0 + $0x60] sm:$0xff]  ;;  %v114_v59 = vadd.f32 %v1583_v14, %v75_v52  ;;  %v39_v2 = vld [vmem:[%s2340_s0 + $0x68] sm:$0xff]  ;;  %v79_v7 = vmul.f32 %v1571_v10, %v40_v3 }
  0x15   :  { %1334 = vmatpush3.bf16.msra.mxu0 %v1331_v19  ;;  %1356 = vmatprep.subr.bf16.mxu1 %v1355_v8  ;;  %v68_v19 = vmul.f32 %v1571_v10, %v29_v15  ;;  %v112_v51 = vadd.f32 %v1583_v14, %v73_v44  ;;  %v113_v57 = vadd.f32 %v1583_v14, %v74_v50  ;;  %v42_v9 = vld [vmem:[%s2340_s0 + $0x80] sm:$0xff] }
  0x16   :  { %1336 = vmatprep.subr.bf16.mxu0 %v1335_v31  ;;  %v77_v63 = vmul.f32 %v1571_v10, %v38_v56  ;;  %v115_v4 = vadd.f32 %v1583_v14, %v76_v58  ;;  %v78_v5 = vmul.f32 %v1571_v10, %v39_v2  ;;  %v118_v13 = vadd.f32 %v1583_v14, %v79_v7 }
  0x17   :  { %v107_v27 = vadd.f32 %v1583_v14, %v68_v19  ;;  %v81_v15 = vmul.f32 %v1571_v10, %v42_v9  ;;  %v82_v19 = vmul.f32 %v1571_v10, %v43_v16 }
  0x18   :  { %1358 = vmatpush3.bf16.msra.mxu1 %v1355_v8  ;;  %v41_v8 = vld [vmem:[%s2340_s0 + $0x78] sm:$0xff]  ;;  %v117_v11 = vadd.f32 %v1583_v14, %v78_v5 }
  0x19   :  { %1338 = vmatpush3.bf16.msra.mxu0 %v1335_v31  ;;  %1360 = vmatprep.subr.bf16.mxu1 %v1359_v17  ;;  %v108_v31 = vadd.f32 %v1583_v14, %v69_v23  ;;  %v80_v12 = vmul.f32 %v1571_v10, %v41_v8  ;;  %v120_v20 = vadd.f32 %v1583_v14, %v81_v15  ;;  %v46_v23 = vld [vmem:[%s2340_s0 + $0xa0] sm:$0xff] }
  0x1a   :  { %1340 = vmatprep.subr.bf16.mxu0 %v1339_v37  ;;  %v121_v24 = vadd.f32 %v1583_v14, %v82_v19 }
  0x1c   :  { %1362 = vmatpush3.bf16.msra.mxu1 %v1359_v17  ;;  %v44_v17 = vld [vmem:[%s2340_s0 + $0x90] sm:$0xff] }
  0x1d   :  { %1342 = vmatpush3.bf16.msra.mxu0 %v1339_v37  ;;  %1364 = vmatprep.subr.bf16.mxu1 %v1363_v26  ;;  %v72_v37 = vmul.f32 %v1571_v10, %v33_v33  ;;  %v83_v21 = vmul.f32 %v1571_v10, %v44_v17 }
  0x1e   :  { %1344 = vmatprep.subr.bf16.mxu0 %v1343_v6 }
  0x1f   :  { %v111_v49 = vadd.f32 %v1583_v14, %v72_v37 }
  0x20   :  { %1366 = vmatpush3.bf16.msra.mxu1 %v1363_v26  ;;  %v122_v26 = vadd.f32 %v1583_v14, %v83_v21 }
  0x21   :  { %1346 = vmatpush3.bf16.msra.mxu0 %v1343_v6  ;;  %1368 = vmatprep.subr.bf16.mxu1 %v1367_v35  ;;  %v116_v6 = vadd.f32 %v1583_v14, %v77_v63 }
  0x24   :  { %1188 = vmatmul.mubr.f32.vlgmr.msra.gmra.mrb[0].mxu0 %v105_v18  ;;  %1370 = vmatpush3.bf16.msra.mxu1 %v1367_v35  ;;  %v119_v18 = vadd.f32 %v1583_v14, %v80_v12 }
  0x25   :  { %1190 = vmatprep.mubr.f32.mxu0 %v106_v22  ;;  %1372 = vmatprep.subr.bf16.mxu1 %v1371_v47  ;;  %v45_v22 = vld [vmem:[%s2340_s0 + $0x98] sm:$0xff] }
  0x26   :  { %v84_v25 = vmul.f32 %v1571_v10, %v45_v22 }
  0x28   :  { %1191 = vmatmul.mubr.f32.gmra.mrb[2].mxu0 %v107_v27  ;;  %1374 = vmatpush3.bf16.msra.mxu1 %v1371_v47  ;;  %v85_v27 = vmul.f32 %v1571_v10, %v46_v23  ;;  %v123_v28 = vadd.f32 %v1583_v14, %v84_v25  ;;  %v430_v10 = vld [vmem:[%s2343_s5 + $0x70] sm:$0xff] }
  0x29   :  { %1193 = vmatprep.mubr.f32.mxu0 %v108_v31 }
  0x2a   :  { %v124_v29 = vadd.f32 %v1583_v14, %v85_v27  ;;  %v431_v14 = vld [vmem:[%s2343_s5 + $0x78] sm:$0xff] }
  0x2c   :  { %1194 = vmatmul.mubr.f32.gmra.mrb[4].mxu0 %v109_v36 }
  0x2d   :  { %1196 = vmatprep.mubr.f32.mxu0 %v110_v41 }
  0x30   :  { %1197 = vmatmul.mubr.f32.gmra.mrb[6].mxu0 %v111_v49 }
  0x31   :  { %1199 = vmatprep.mubr.f32.mxu0 %v112_v51 }
  0x34   :  { %1200 = vmatmul.mubr.f32.gmra.mrb[8].mxu0 %v113_v57 }
  0x35   :  { %1202 = vmatprep.mubr.f32.mxu0 %v114_v59 }
  0x38   :  { %1203 = vmatmul.mubr.f32.gmra.mrb[10].mxu0 %v115_v4 }
  0x39   :  { %1205 = vmatprep.mubr.f32.mxu0 %v116_v6 }
  0x3c   :  { %1206 = vmatmul.mubr.f32.gmra.mrb[12].mxu0 %v117_v11 }
  0x3d   :  { %1208 = vmatprep.mubr.f32.mxu0 %v118_v13 }
  0x40   :  { %1209 = vmatmul.mubr.f32.gmra.mrb[14].mxu0 %v119_v18 }
  0x41   :  { %1211 = vmatprep.mubr.f32.mxu0 %v120_v20 }
  0x44   :  { %1212 = vmatmul.mubr.f32.gmra.mrb[16].mxu0 %v121_v24 }
  0x45   :  { %1214 = vmatprep.mubr.f32.mxu0 %v122_v26 }
  0x48   :  { %1215 = vmatmul.mubr.f32.gmra.mrb[18].mxu0 %v123_v28 }
  0x49   :  { %1217 = vmatprep.mubr.f32.mxu0 %v124_v29 }
  0x4c   :  { %1218 = vmatmul.mubr.f32.gmra.mrb[20].mxu0 %v1635_v38  ;;  %v1375_v38 = vpack.c.bf16 %v431_v14, %v430_v10 }
  0x4d   :  { %1220 = vmatprep.mubr.f32.mxu0 %v1645_v42  ;;  %v1849_v42 = vld [vmem:[%s2344_s4] ss:$0 sm:$0xff] }
  0x4e   :  { %1376 = vmatprep.subr.bf16.mxu1 %v1375_v38 }
  0x4f   :  { %1378 = vmatpush3.bf16.msra.mxu1 %v1375_v38 }
  0x50   :  { %1221 = vmatmul.mubr.f32.gmra.mrb[22].mxu0 %v1648_v43 }
  0x51   :  { %1223 = vmatprep.mubr.f32.mxu0 %v1659_v48 }
  0x54   :  { %1224 = vmatmul.mubr.f32.gmra.mrb[24].mxu0 %v1671_v54 }
  0x55   :  { %1226 = vmatprep.mubr.f32.mxu0 %v1674_v55 }
  0x58   :  { %1227 = vmatmul.mubr.f32.gmra.mrb[26].mxu0 %v1685_v60 }
  0x59   :  { %1229 = vmatprep.mubr.f32.mxu0 %v1688_v61 }
  0x5c   :  { %1230 = vmatmul.mubr.f32.gmra.mrb[28].mxu0 %v1691_v62 }
  0x5d   :  { %1232 = vmatprep.mubr.f32.mxu0 %v1694_v0 }
  0x60   :  { %1233 = vmatmul.mubr.f32.gmra.mrb[30].mxu0 %v1697_v1 }
  0xf7   :  { %v1189_v43 = vpop.f32.mrb[0].mxu0 }
  0xf8   :  { %v231_v48 = vadd.f32 %v1189_v43, %v1849_v42  ;;  %v225_v54 = vpop.f32.mrb[1].mxu0 }
  0xf9   :  { %v226_v55 = vadd.f32 %v1849_v42, %v225_v54 }
  0xfa   :  { %v385_v62 = vmax.f32 %v231_v48, 0.0 }
  0xfb   :  { %v1192_v60 = vpop.f32.mrb[2].mxu0  ;;  %v384_v61 = vmax.f32 %v226_v55, 0.0 }
  0xfc   :  { %v241_v0 = vadd.f32 %v1192_v60, %v1849_v42  ;;  %v235_v1 = vpop.f32.mrb[3].mxu0 }
  0xfd   :  { %v236_v30 = vadd.f32 %v1849_v42, %v235_v1  ;;  %1267 = vmatprep.mubr.f32.mxu1 %v384_v61 }
  0xfe   :  { %1268 = vmatmul.mubr.f32.vlgmr.msra.gmra.mrb[0].mxu1 %v385_v62  ;;  %v387_v33 = vmax.f32 %v241_v0, 0.0 }
  0xff   :  { %v386_v31 = vmax.f32 %v236_v30, 0.0  ;;  %v1195_v32 = vpop.f32.mrb[4].mxu0 }
 0x100   :  { %v251_v34 = vadd.f32 %v1195_v32, %v1849_v42  ;;  %v245_v35 = vpop.f32.mrb[5].mxu0 }
 0x101   :  { %v246_v36 = vadd.f32 %v1849_v42, %v245_v35  ;;  %1270 = vmatprep.mubr.f32.mxu1 %v386_v31 }
 0x102   :  { %v389_v37 = vmax.f32 %v251_v34, 0.0  ;;  %1271 = vmatmul.mubr.f32.gmra.mrb[2].mxu1 %v387_v33 }
 0x103   :  { %v388_v39 = vmax.f32 %v246_v36, 0.0  ;;  %v1198_v40 = vpop.f32.mrb[6].mxu0 }
 0x104   :  { %v261_v41 = vadd.f32 %v1198_v40, %v1849_v42  ;;  %v255_v44 = vpop.f32.mrb[7].mxu0 }
 0x105   :  { %v256_v45 = vadd.f32 %v1849_v42, %v255_v44  ;;  %1273 = vmatprep.mubr.f32.mxu1 %v388_v39 }
 0x106   :  { %v391_v46 = vmax.f32 %v261_v41, 0.0  ;;  %1274 = vmatmul.mubr.f32.gmra.mrb[4].mxu1 %v389_v37 }
 0x107   :  { %v390_v47 = vmax.f32 %v256_v45, 0.0  ;;  %v1201_v49 = vpop.f32.mrb[8].mxu0 }
 0x108   :  { %v271_v50 = vadd.f32 %v1201_v49, %v1849_v42  ;;  %v265_v51 = vpop.f32.mrb[9].mxu0 }
 0x109   :  { %v266_v52 = vadd.f32 %v1849_v42, %v265_v51  ;;  %1276 = vmatprep.mubr.f32.mxu1 %v390_v47 }
 0x10a   :  { %v393_v53 = vmax.f32 %v271_v50, 0.0  ;;  %1277 = vmatmul.mubr.f32.gmra.mrb[6].mxu1 %v391_v46 }
 0x10b   :  { %v392_v56 = vmax.f32 %v266_v52, 0.0  ;;  %v1204_v57 = vpop.f32.mrb[10].mxu0 }
 0x10c   :  { %v281_v58 = vadd.f32 %v1204_v57, %v1849_v42  ;;  %v275_v59 = vpop.f32.mrb[11].mxu0 }
 0x10d   :  { %v276_v63 = vadd.f32 %v1849_v42, %v275_v59  ;;  %1279 = vmatprep.mubr.f32.mxu1 %v392_v56 }
 0x10e   :  { %v395_v2 = vmax.f32 %v281_v58, 0.0  ;;  %1280 = vmatmul.mubr.f32.gmra.mrb[8].mxu1 %v393_v53 }
 0x10f   :  { %v394_v3 = vmax.f32 %v276_v63, 0.0  ;;  %v1207_v4 = vpop.f32.mrb[12].mxu0  ;;  %v664_v63 = vlaneseq }
 0x110   :  { %v291_v5 = vadd.f32 %v1207_v4, %v1849_v42  ;;  %v285_v6 = vpop.f32.mrb[13].mxu0 }
 0x111   :  { %v286_v7 = vadd.f32 %v1849_v42, %v285_v6  ;;  %1282 = vmatprep.mubr.f32.mxu1 %v394_v3  ;;  %v1888_v3 = vld [vmem:[%s2345_s6] ss:$0 sm:$0xff] }
 0x112   :  { %v397_v8 = vmax.f32 %v291_v5, 0.0  ;;  %1283 = vmatmul.mubr.f32.gmra.mrb[10].mxu1 %v395_v2  ;;  %v1883_v2 = vand.u32 127, %v664_v63 }
 0x113   :  { %v396_v9 = vmax.f32 %v286_v7, 0.0  ;;  %v1210_v11 = vpop.f32.mrb[14].mxu0 }
 0x114   :  { %v301_v12 = vadd.f32 %v1210_v11, %v1849_v42  ;;  %v295_v13 = vpop.f32.mrb[15].mxu0  ;;  %vm666_vm0 = vcmp.lt.s32.totalorder %v1883_v2, 8 }
 0x115   :  { %v296_v15 = vadd.f32 %v1849_v42, %v295_v13  ;;  %1285 = vmatprep.mubr.f32.mxu1 %v396_v9 }
 0x116   :  { %v399_v16 = vmax.f32 %v301_v12, 0.0  ;;  %1286 = vmatmul.mubr.f32.gmra.mrb[12].mxu1 %v397_v8 }
 0x117   :  { %v398_v17 = vmax.f32 %v296_v15, 0.0  ;;  %v1213_v18 = vpop.f32.mrb[16].mxu0 }
 0x118   :  { %v311_v19 = vadd.f32 %v1213_v18, %v1849_v42  ;;  %v305_v20 = vpop.f32.mrb[17].mxu0 }
 0x119   :  { %v306_v21 = vadd.f32 %v1849_v42, %v305_v20  ;;  %1288 = vmatprep.mubr.f32.mxu1 %v398_v17 }
 0x11a   :  { %v401_v22 = vmax.f32 %v311_v19, 0.0  ;;  %1289 = vmatmul.mubr.f32.gmra.mrb[14].mxu1 %v399_v16 }
 0x11b   :  { %v400_v23 = vmax.f32 %v306_v21, 0.0  ;;  %v1216_v24 = vpop.f32.mrb[18].mxu0 }
 0x11c   :  { %v321_v25 = vadd.f32 %v1216_v24, %v1849_v42  ;;  %v315_v26 = vpop.f32.mrb[19].mxu0 }
 0x11d   :  { %v316_v27 = vadd.f32 %v1849_v42, %v315_v26  ;;  %1291 = vmatprep.mubr.f32.mxu1 %v400_v23 }
 0x11e   :  { %v403_v28 = vmax.f32 %v321_v25, 0.0  ;;  %1292 = vmatmul.mubr.f32.gmra.mrb[16].mxu1 %v401_v22 }
 0x11f   :  { %v402_v29 = vmax.f32 %v316_v27, 0.0  ;;  %v1219_v10 = vpop.f32.mrb[20].mxu0 }
 0x120   :  { %v331_v14 = vadd.f32 %v1219_v10, %v1849_v42  ;;  %v325_v38 = vpop.f32.mrb[21].mxu0 }
 0x121   :  { %v326_v43 = vadd.f32 %v1849_v42, %v325_v38  ;;  %1294 = vmatprep.mubr.f32.mxu1 %v402_v29 }
 0x122   :  { %v405_v48 = vmax.f32 %v331_v14, 0.0  ;;  %1295 = vmatmul.mubr.f32.gmra.mrb[18].mxu1 %v403_v28 }
 0x123   :  { %v404_v54 = vmax.f32 %v326_v43, 0.0  ;;  %v1222_v55 = vpop.f32.mrb[22].mxu0 }
 0x124   :  { %v341_v60 = vadd.f32 %v1222_v55, %v1849_v42  ;;  %v335_v61 = vpop.f32.mrb[23].mxu0 }
 0x125   :  { %v336_v62 = vadd.f32 %v1849_v42, %v335_v61  ;;  %1297 = vmatprep.mubr.f32.mxu1 %v404_v54 }
 0x126   :  { %v407_v0 = vmax.f32 %v341_v60, 0.0  ;;  %1298 = vmatmul.mubr.f32.gmra.mrb[20].mxu1 %v405_v48 }
 0x127   :  { %v406_v1 = vmax.f32 %v336_v62, 0.0  ;;  %v1225_v30 = vpop.f32.mrb[24].mxu0 }
 0x128   :  { %v351_v31 = vadd.f32 %v1225_v30, %v1849_v42  ;;  %v345_v32 = vpop.f32.mrb[25].mxu0 }
 0x129   :  { %v346_v33 = vadd.f32 %v1849_v42, %v345_v32  ;;  %1300 = vmatprep.mubr.f32.mxu1 %v406_v1 }
 0x12a   :  { %v409_v34 = vmax.f32 %v351_v31, 0.0  ;;  %1301 = vmatmul.mubr.f32.gmra.mrb[22].mxu1 %v407_v0 }
 0x12b   :  { %v408_v35 = vmax.f32 %v346_v33, 0.0  ;;  %v1228_v36 = vpop.f32.mrb[26].mxu0 }
 0x12c   :  { %v361_v37 = vadd.f32 %v1228_v36, %v1849_v42  ;;  %v355_v39 = vpop.f32.mrb[27].mxu0 }
 0x12d   :  { %v356_v40 = vadd.f32 %v1849_v42, %v355_v39  ;;  %1303 = vmatprep.mubr.f32.mxu1 %v408_v35 }
 0x12e   :  { %v411_v41 = vmax.f32 %v361_v37, 0.0  ;;  %1304 = vmatmul.mubr.f32.gmra.mrb[24].mxu1 %v409_v34 }
 0x12f   :  { %v410_v44 = vmax.f32 %v356_v40, 0.0  ;;  %v1231_v45 = vpop.f32.mrb[28].mxu0 }
 0x130   :  { %v371_v46 = vadd.f32 %v1231_v45, %v1849_v42  ;;  %v365_v47 = vpop.f32.mrb[29].mxu0 }
 0x131   :  { %v366_v49 = vadd.f32 %v1849_v42, %v365_v47  ;;  %1306 = vmatprep.mubr.f32.mxu1 %v410_v44 }
 0x132   :  { %v413_v50 = vmax.f32 %v371_v46, 0.0  ;;  %1307 = vmatmul.mubr.f32.gmra.mrb[26].mxu1 %v411_v41 }
 0x133   :  { %v412_v51 = vmax.f32 %v366_v49, 0.0  ;;  %v1234_v52 = vpop.f32.mrb[30].mxu0 }
 0x134   :  { %v381_v53 = vadd.f32 %v1234_v52, %v1849_v42  ;;  %v375_v56 = vpop.f32.mrb[31].mxu0 }
 0x135   :  { %v376_v57 = vadd.f32 %v1849_v42, %v375_v56  ;;  %1309 = vmatprep.mubr.f32.mxu1 %v412_v51 }
 0x136   :  { %v415_v58 = vmax.f32 %v381_v53, 0.0  ;;  %1310 = vmatmul.mubr.f32.gmra.mrb[28].mxu1 %v413_v50 }
 0x137   :  { %v414_v59 = vmax.f32 %v376_v57, 0.0 }
 0x139   :  { %1312 = vmatprep.mubr.f32.mxu1 %v414_v59 }
 0x13a   :  { %1313 = vmatmul.mubr.f32.gmra.mrb[30].mxu1 %v415_v58 }
 0x1d1   :  { %v1269_v4 = vpop.f32.mrb[0].mxu1 }
 0x1d2   :  { %v511_v5 = vadd.f32 %v1269_v4, %v1888_v3  ;;  %v505_v42 = vpop.f32.mrb[1].mxu1 }
 0x1d3   :  { %v506_v6 = vadd.f32 %v1888_v3, %v505_v42 }
 0x1d4   :  { %v1895_v7 = vsel %vm666_vm0, %v511_v5, -1e+30 }
 0x1d5   :  { %701 = vmax.xlane.f32.xlu0 %v1895_v7  ;;  %v1272_v8 = vpop.f32.mrb[2].mxu1  ;;  %v1906_v15 = vsel %vm666_vm0, %v506_v6, -1e+30 }
 0x1d6   :  { %v521_v9 = vadd.f32 %v1272_v8, %v1888_v3  ;;  %v515_v11 = vpop.f32.mrb[3].mxu1 }
 0x1d7   :  { %v516_v12 = vadd.f32 %v1888_v3, %v515_v11 }
 0x1d8   :  { %v1902_v13 = vsel %vm666_vm0, %v521_v9, -1e+30 }
 0x1d9   :  { %705 = vmax.xlane.f32.xlu1 %v1902_v13  ;;  %v1275_v16 = vpop.f32.mrb[4].mxu1  ;;  %699 = vmax.xlane.f32.xlu0 %v1906_v15  ;;  %v1914_v20 = vsel %vm666_vm0, %v516_v12, -1e+30 }
 0x1da   :  { %v525_v17 = vpop.f32.mrb[5].mxu1  ;;  %v531_v19 = vadd.f32 %v1275_v16, %v1888_v3 }
 0x1db   :  { %v526_v18 = vadd.f32 %v1888_v3, %v525_v17 }
 0x1dc   :  { %v1926_v26 = vsel %vm666_vm0, %v531_v19, -1e+30 }
 0x1dd   :  { %v1278_v21 = vpop.f32.mrb[6].mxu1  ;;  %703 = vmax.xlane.f32.xlu1 %v1914_v20  ;;  %v1919_v22 = vsel %vm666_vm0, %v526_v18, -1e+30 }
 0x1de   :  { %v535_v23 = vpop.f32.mrb[7].mxu1  ;;  %707 = vmax.xlane.f32.xlu0 %v1919_v22  ;;  %v541_v25 = vadd.f32 %v1278_v21, %v1888_v3 }
 0x1df   :  { %v536_v24 = vadd.f32 %v1888_v3, %v535_v23 }
 0x1e0   :  { %v1938_v38 = vsel %vm666_vm0, %v541_v25, -1e+30 }
 0x1e1   :  { %v1281_v27 = vpop.f32.mrb[8].mxu1  ;;  %709 = vmax.xlane.f32.xlu1 %v1926_v26  ;;  %v1931_v28 = vsel %vm666_vm0, %v536_v24, -1e+30 }
 0x1e2   :  { %v545_v29 = vpop.f32.mrb[9].mxu1  ;;  %711 = vmax.xlane.f32.xlu0 %v1931_v28  ;;  %v551_v14 = vadd.f32 %v1281_v27, %v1888_v3 }
 0x1e3   :  { %v546_v10 = vadd.f32 %v1888_v3, %v545_v29 }
 0x1e4   :  { %v1950_v61 = vsel %vm666_vm0, %v551_v14, -1e+30 }
 0x1e5   :  { %v1284_v43 = vpop.f32.mrb[10].mxu1  ;;  %713 = vmax.xlane.f32.xlu1 %v1938_v38  ;;  %v1943_v48 = vsel %vm666_vm0, %v546_v10, -1e+30 }
 0x1e6   :  { %v555_v54 = vpop.f32.mrb[11].mxu1  ;;  %715 = vmax.xlane.f32.xlu0 %v1943_v48  ;;  %v561_v60 = vadd.f32 %v1284_v43, %v1888_v3 }
 0x1e7   :  { %v556_v55 = vadd.f32 %v1888_v3, %v555_v54 }
 0x1e8   :  { %v1962_v32 = vsel %vm666_vm0, %v561_v60, -1e+30 }
 0x1e9   :  { %v1287_v62 = vpop.f32.mrb[12].mxu1  ;;  %717 = vmax.xlane.f32.xlu1 %v1950_v61  ;;  %v1955_v0 = vsel %vm666_vm0, %v556_v55, -1e+30 }
 0x1ea   :  { %v565_v1 = vpop.f32.mrb[13].mxu1  ;;  %719 = vmax.xlane.f32.xlu0 %v1955_v0  ;;  %v571_v31 = vadd.f32 %v1287_v62, %v1888_v3 }
 0x1eb   :  { %v566_v30 = vadd.f32 %v1888_v3, %v565_v1 }
 0x1ec   :  { %v1974_v39 = vsel %vm666_vm0, %v571_v31, -1e+30 }
 0x1ed   :  { %v1290_v33 = vpop.f32.mrb[14].mxu1  ;;  %721 = vmax.xlane.f32.xlu1 %v1962_v32  ;;  %v1967_v34 = vsel %vm666_vm0, %v566_v30, -1e+30 }
 0x1ee   :  { %v575_v35 = vpop.f32.mrb[15].mxu1  ;;  %723 = vmax.xlane.f32.xlu0 %v1967_v34  ;;  %v581_v37 = vadd.f32 %v1290_v33, %v1888_v3 }
 0x1ef   :  { %v576_v36 = vadd.f32 %v1888_v3, %v575_v35 }
 0x1f0   :  { %v1986_v47 = vsel %vm666_vm0, %v581_v37, -1e+30 }
 0x1f1   :  { %v1293_v40 = vpop.f32.mrb[16].mxu1  ;;  %725 = vmax.xlane.f32.xlu1 %v1974_v39  ;;  %v1979_v41 = vsel %vm666_vm0, %v576_v36, -1e+30 }
 0x1f2   :  { %v585_v44 = vpop.f32.mrb[17].mxu1  ;;  %727 = vmax.xlane.f32.xlu0 %v1979_v41  ;;  %v591_v46 = vadd.f32 %v1293_v40, %v1888_v3 }
 0x1f3   :  { %v586_v45 = vadd.f32 %v1888_v3, %v585_v44 }
 0x1f4   :  { %v1998_v56 = vsel %vm666_vm0, %v591_v46, -1e+30 }
 0x1f5   :  { %v1296_v49 = vpop.f32.mrb[18].mxu1  ;;  %729 = vmax.xlane.f32.xlu1 %v1986_v47  ;;  %v1991_v50 = vsel %vm666_vm0, %v586_v45, -1e+30 }
 0x1f6   :  { %v595_v51 = vpop.f32.mrb[19].mxu1  ;;  %731 = vmax.xlane.f32.xlu0 %v1991_v50  ;;  %v601_v53 = vadd.f32 %v1296_v49, %v1888_v3 }
 0x1f7   :  { %v596_v52 = vadd.f32 %v1888_v3, %v595_v51 }
 0x1f8   :  { %v2010_v5 = vsel %vm666_vm0, %v601_v53, -1e+30 }
 0x1f9   :  { %v1299_v57 = vpop.f32.mrb[20].mxu1  ;;  %733 = vmax.xlane.f32.xlu1 %v1998_v56  ;;  %v2003_v58 = vsel %vm666_vm0, %v596_v52, -1e+30 }
 0x1fa   :  { %v605_v59 = vpop.f32.mrb[21].mxu1  ;;  %735 = vmax.xlane.f32.xlu0 %v2003_v58  ;;  %v611_v4 = vadd.f32 %v1299_v57, %v1888_v3 }
 0x1fb   :  { %v606_v63 = vadd.f32 %v1888_v3, %v605_v59 }
 0x1fc   :  { %v2022_v12 = vsel %vm666_vm0, %v611_v4, -1e+30 }
 0x1fd   :  { %v1302_v42 = vpop.f32.mrb[22].mxu1  ;;  %737 = vmax.xlane.f32.xlu1 %v2010_v5  ;;  %v2015_v6 = vsel %vm666_vm0, %v606_v63, -1e+30 }
 0x1fe   :  { %v615_v8 = vpop.f32.mrb[23].mxu1  ;;  %739 = vmax.xlane.f32.xlu0 %v2015_v6  ;;  %v621_v11 = vadd.f32 %v1302_v42, %v1888_v3 }
 0x1ff   :  { %v616_v9 = vadd.f32 %v1888_v3, %v615_v8 }
 0x200   :  { %v2034_v23 = vsel %vm666_vm0, %v621_v11, -1e+30 }
 0x201   :  { %v1305_v16 = vpop.f32.mrb[24].mxu1  ;;  %741 = vmax.xlane.f32.xlu1 %v2022_v12  ;;  %v2027_v17 = vsel %vm666_vm0, %v616_v9, -1e+30 }
 0x202   :  { %v625_v18 = vpop.f32.mrb[25].mxu1  ;;  %743 = vmax.xlane.f32.xlu0 %v2027_v17  ;;  %v631_v21 = vadd.f32 %v1305_v16, %v1888_v3 }
 0x203   :  { %v626_v19 = vadd.f32 %v1888_v3, %v625_v18 }
 0x204   :  { %v2046_v14 = vsel %vm666_vm0, %v631_v21, -1e+30 }
 0x205   :  { %v1308_v24 = vpop.f32.mrb[26].mxu1  ;;  %745 = vmax.xlane.f32.xlu1 %v2034_v23  ;;  %v2039_v25 = vsel %vm666_vm0, %v626_v19, -1e+30 }
 0x206   :  { %v635_v27 = vpop.f32.mrb[27].mxu1  ;;  %747 = vmax.xlane.f32.xlu0 %v2039_v25  ;;  %v641_v10 = vadd.f32 %v1308_v24, %v1888_v3 }
 0x207   :  { %v636_v29 = vadd.f32 %v1888_v3, %v635_v27 }
 0x208   :  { %v2058_v1 = vsel %vm666_vm0, %v641_v10, -1e+30 }
 0x209   :  { %v1311_v43 = vpop.f32.mrb[28].mxu1  ;;  %749 = vmax.xlane.f32.xlu1 %v2046_v14  ;;  %v2051_v54 = vsel %vm666_vm0, %v636_v29, -1e+30 }
 0x20a   :  { %v645_v55 = vpop.f32.mrb[29].mxu1  ;;  %751 = vmax.xlane.f32.xlu0 %v2051_v54  ;;  %v651_v62 = vadd.f32 %v1311_v43, %v1888_v3 }
 0x20b   :  { %v646_v60 = vadd.f32 %v1888_v3, %v645_v55 }
 0x20c   :  { %v2070_v37 = vsel %vm666_vm0, %v651_v62, -1e+30 }
 0x20d   :  { %v1314_v30 = vpop.f32.mrb[30].mxu1  ;;  %753 = vmax.xlane.f32.xlu1 %v2058_v1  ;;  %v2063_v31 = vsel %vm666_vm0, %v646_v60, -1e+30 }
 0x20e   :  { %v661_v33 = vadd.f32 %v1314_v30, %v1888_v3  ;;  %v655_v35 = vpop.f32.mrb[31].mxu1  ;;  %755 = vmax.xlane.f32.xlu0 %v2063_v31 }
 0x20f   :  { %v656_v36 = vadd.f32 %v1888_v3, %v655_v35 }
 0x210   :  { %v2074_v40 = vsel %vm666_vm0, %v661_v33, -1e+30 }
 0x211   :  { %757 = vmax.xlane.f32.xlu1 %v2070_v37  ;;  %v2079_v44 = vsel %vm666_vm0, %v656_v36, -1e+30 }
 0x212   :  { %759 = vmax.xlane.f32.xlu0 %v2079_v44 }
 0x215   :  { %761 = vmax.xlane.f32.xlu1 %v2074_v40 }
 0x262   :  { %v702_v45 = vpop.xlane.xlu0 %701 }
 0x263   :  { %v2084_v3 = vsub.f32 %v1895_v7, %v702_v45 }
 0x265   :  { %v797_v46 = vmul.f32 1.442695, %v2084_v3 }
 0x266   :  { %v706_v49 = vpop.xlane.xlu1 %705  ;;  %v700_v51 = vpop.xlane.xlu0 %699 }
 0x267   :  { %1379 = vpow2.f32 %v797_v46  ;;  %v2088_v52 = vsub.f32 %v1902_v13, %v706_v49  ;;  %v2091_v2 = vsub.f32 %v1906_v15, %v700_v51 }
 0x269   :  { %v801_v53 = vmul.f32 1.442695, %v2088_v52  ;;  %v795_v57 = vmul.f32 1.442695, %v2091_v2 }
 0x26a   :  { %v704_v59 = vpop.xlane.xlu1 %703 }
 0x26b   :  { %1381 = vpow2.f32 %v801_v53  ;;  %v2096_v7 = vsub.f32 %v1914_v20, %v704_v59  ;;  %v708_v63 = vpop.xlane.xlu0 %707 }
 0x26c   :  { %1383 = vpow2.f32 %v795_v57  ;;  %v2099_v4 = vsub.f32 %v1919_v22, %v708_v63 }
 0x26d   :  { %v799_v13 = vmul.f32 1.442695, %v2096_v7 }
 0x26e   :  { %v710_v42 = vpop.xlane.xlu1 %709  ;;  %v803_v9 = vmul.f32 1.442695, %v2099_v4 }
 0x26f   :  { %1385 = vpow2.f32 %v799_v13  ;;  %v2103_v15 = vsub.f32 %v1926_v26, %v710_v42  ;;  %v712_v8 = vpop.xlane.xlu0 %711 }
 0x270   :  { %v2107_v11 = vsub.f32 %v1931_v28, %v712_v8 }
 0x271   :  { %v1380_v20 = vpop.eup %1379  ;;  %v805_v16 = vmul.f32 1.442695, %v2103_v15 }
 0x272   :  { %861 = vadd.xlane.f32.xlu1 %v1380_v20  ;;  %v714_v18 = vpop.xlane.xlu1 %713  ;;  %v807_v26 = vmul.f32 1.442695, %v2107_v11 }
 0x273   :  { %1387 = vpow2.f32 %v805_v16  ;;  %v2111_v22 = vsub.f32 %v1938_v38, %v714_v18  ;;  %v716_v19 = vpop.xlane.xlu0 %715 }
 0x274   :  { %1389 = vpow2.f32 %v803_v9  ;;  %v2115_v21 = vsub.f32 %v1943_v48, %v716_v19 }
 0x275   :  { %v1382_v24 = vpop.eup %1381  ;;  %v809_v28 = vmul.f32 1.442695, %v2111_v22 }
 0x276   :  { %v1384_v27 = vpop.eup %1383  ;;  %865 = vadd.xlane.f32.xlu1 %v1382_v24  ;;  %v718_v29 = vpop.xlane.xlu1 %717  ;;  %v811_v43 = vmul.f32 1.442695, %v2115_v21 }
 0x277   :  { %1391 = vpow2.f32 %v809_v28  ;;  %v2119_v10 = vsub.f32 %v1950_v61, %v718_v29  ;;  %859 = vadd.xlane.f32.xlu0 %v1384_v27  ;;  %v720_v38 = vpop.xlane.xlu0 %719 }
 0x278   :  { %1393 = vpow2.f32 %v807_v26  ;;  %v2123_v55 = vsub.f32 %v1955_v0, %v720_v38 }
 0x279   :  { %v1386_v48 = vpop.eup %1385  ;;  %v813_v60 = vmul.f32 1.442695, %v2119_v10 }
 0x27a   :  { %v722_v62 = vpop.xlane.xlu1 %721  ;;  %v815_v61 = vmul.f32 1.442695, %v2123_v55 }
 0x27b   :  { %1395 = vpow2.f32 %v813_v60  ;;  %v2127_v30 = vsub.f32 %v1962_v32, %v722_v62  ;;  %863 = vadd.xlane.f32.xlu0 %v1386_v48  ;;  %v724_v33 = vpop.xlane.xlu0 %723 }
 0x27c   :  { %1397 = vpow2.f32 %v811_v43  ;;  %v2131_v35 = vsub.f32 %v1967_v34, %v724_v33 }
 0x27d   :  { %v1388_v36 = vpop.eup %1387  ;;  %v817_v0 = vmul.f32 1.442695, %v2127_v30 }
 0x27e   :  { %v1390_v45 = vpop.eup %1389  ;;  %869 = vadd.xlane.f32.xlu1 %v1388_v36  ;;  %v726_v46 = vpop.xlane.xlu1 %725  ;;  %v819_v51 = vmul.f32 1.442695, %v2131_v35 }
 0x27f   :  { %1399 = vpow2.f32 %v817_v0  ;;  %v2135_v49 = vsub.f32 %v1974_v39, %v726_v46  ;;  %867 = vadd.xlane.f32.xlu0 %v1390_v45  ;;  %v728_v32 = vpop.xlane.xlu0 %727 }
 0x280   :  { %1401 = vpow2.f32 %v815_v61  ;;  %v2139_v53 = vsub.f32 %v1979_v41, %v728_v32 }
 0x281   :  { %v1392_v34 = vpop.eup %1391  ;;  %v821_v57 = vmul.f32 1.442695, %v2135_v49 }
 0x282   :  { %v1394_v59 = vpop.eup %1393  ;;  %873 = vadd.xlane.f32.xlu1 %v1392_v34  ;;  %v730_v63 = vpop.xlane.xlu1 %729  ;;  %v823_v42 = vmul.f32 1.442695, %v2139_v53 }
 0x283   :  { %1403 = vpow2.f32 %v821_v57  ;;  %v2143_v13 = vsub.f32 %v1986_v47, %v730_v63  ;;  %871 = vadd.xlane.f32.xlu0 %v1394_v59  ;;  %v732_v39 = vpop.xlane.xlu0 %731 }
 0x284   :  { %1405 = vpow2.f32 %v819_v51  ;;  %v2147_v8 = vsub.f32 %v1991_v50, %v732_v39 }
 0x285   :  { %v1396_v41 = vpop.eup %1395  ;;  %v825_v9 = vmul.f32 1.442695, %v2143_v13 }
 0x286   :  { %v1398_v20 = vpop.eup %1397  ;;  %877 = vadd.xlane.f32.xlu1 %v1396_v41  ;;  %v734_v16 = vpop.xlane.xlu1 %733  ;;  %v827_v19 = vmul.f32 1.442695, %v2147_v8 }
 0x287   :  { %1407 = vpow2.f32 %v825_v9  ;;  %v2151_v18 = vsub.f32 %v1998_v56, %v734_v16  ;;  %875 = vadd.xlane.f32.xlu0 %v1398_v20  ;;  %v736_v47 = vpop.xlane.xlu0 %735 }
 0x288   :  { %1409 = vpow2.f32 %v823_v42  ;;  %v2155_v26 = vsub.f32 %v2003_v58, %v736_v47 }
 0x289   :  { %v1400_v50 = vpop.eup %1399  ;;  %v829_v24 = vmul.f32 1.442695, %v2151_v18 }
 0x28a   :  { %v1402_v28 = vpop.eup %1401  ;;  %881 = vadd.xlane.f32.xlu1 %v1400_v50  ;;  %v738_v27 = vpop.xlane.xlu1 %737  ;;  %v831_v38 = vmul.f32 1.442695, %v2155_v26 }
 0x28b   :  { %1411 = vpow2.f32 %v829_v24  ;;  %v2159_v29 = vsub.f32 %v2010_v5, %v738_v27  ;;  %879 = vadd.xlane.f32.xlu0 %v1402_v28  ;;  %v740_v56 = vpop.xlane.xlu0 %739 }
 0x28c   :  { %1413 = vpow2.f32 %v827_v19  ;;  %v2163_v43 = vsub.f32 %v2015_v6, %v740_v56 }
 0x28d   :  { %v1404_v58 = vpop.eup %1403  ;;  %v833_v48 = vmul.f32 1.442695, %v2159_v29 }
 0x28e   :  { %v1406_v60 = vpop.eup %1405  ;;  %885 = vadd.xlane.f32.xlu1 %v1404_v58  ;;  %v742_v62 = vpop.xlane.xlu1 %741  ;;  %v835_v61 = vmul.f32 1.442695, %v2163_v43 }
 0x28f   :  { %1415 = vpow2.f32 %v833_v48  ;;  %v2167_v33 = vsub.f32 %v2022_v12, %v742_v62  ;;  %883 = vadd.xlane.f32.xlu0 %v1406_v60  ;;  %v744_v5 = vpop.xlane.xlu0 %743 }
 0x290   :  { %1417 = vpow2.f32 %v831_v38  ;;  %v2171_v36 = vsub.f32 %v2027_v17, %v744_v5 }
 0x291   :  { %v1408_v6 = vpop.eup %1407  ;;  %v837_v0 = vmul.f32 1.442695, %v2167_v33 }
 0x292   :  { %v1410_v45 = vpop.eup %1409  ;;  %889 = vadd.xlane.f32.xlu1 %v1408_v6  ;;  %v746_v46 = vpop.xlane.xlu1 %745  ;;  %v839_v51 = vmul.f32 1.442695, %v2171_v36 }
 0x293   :  { %1419 = vpow2.f32 %v837_v0  ;;  %v2175_v32 = vsub.f32 %v2034_v23, %v746_v46  ;;  %887 = vadd.xlane.f32.xlu0 %v1410_v45  ;;  %v748_v12 = vpop.xlane.xlu0 %747 }
 0x294   :  { %1421 = vpow2.f32 %v835_v61  ;;  %v2179_v34 = vsub.f32 %v2039_v25, %v748_v12 }
 0x295   :  { %v1412_v17 = vpop.eup %1411  ;;  %v841_v57 = vmul.f32 1.442695, %v2175_v32 }
 0x296   :  { %v1414_v59 = vpop.eup %1413  ;;  %893 = vadd.xlane.f32.xlu1 %v1412_v17  ;;  %v750_v63 = vpop.xlane.xlu1 %749  ;;  %v843_v42 = vmul.f32 1.442695, %v2179_v34 }
 0x297   :  { %1423 = vpow2.f32 %v841_v57  ;;  %v2183_v39 = vsub.f32 %v2046_v14, %v750_v63  ;;  %891 = vadd.xlane.f32.xlu0 %v1414_v59  ;;  %v752_v23 = vpop.xlane.xlu0 %751 }
 0x298   :  { %1425 = vpow2.f32 %v839_v51  ;;  %v2187_v41 = vsub.f32 %v2051_v54, %v752_v23 }
 0x299   :  { %v1416_v25 = vpop.eup %1415  ;;  %v845_v9 = vmul.f32 1.442695, %v2183_v39 }
 0x29a   :  { %v1418_v20 = vpop.eup %1417  ;;  %897 = vadd.xlane.f32.xlu1 %v1416_v25  ;;  %v754_v16 = vpop.xlane.xlu1 %753  ;;  %v847_v19 = vmul.f32 1.442695, %v2187_v41 }
 0x29b   :  { %1427 = vpow2.f32 %v845_v9  ;;  %v2191_v47 = vsub.f32 %v2058_v1, %v754_v16  ;;  %895 = vadd.xlane.f32.xlu0 %v1418_v20  ;;  %v756_v14 = vpop.xlane.xlu0 %755 }
 0x29c   :  { %1429 = vpow2.f32 %v843_v42  ;;  %v2195_v50 = vsub.f32 %v2063_v31, %v756_v14 }
 0x29d   :  { %v1420_v54 = vpop.eup %1419  ;;  %v849_v24 = vmul.f32 1.442695, %v2191_v47 }
 0x29e   :  { %v1422_v28 = vpop.eup %1421  ;;  %901 = vadd.xlane.f32.xlu1 %v1420_v54  ;;  %v758_v27 = vpop.xlane.xlu1 %757  ;;  %v851_v38 = vmul.f32 1.442695, %v2195_v50 }
 0x29f   :  { %1431 = vpow2.f32 %v849_v24  ;;  %v2199_v56 = vsub.f32 %v2070_v37, %v758_v27  ;;  %899 = vadd.xlane.f32.xlu0 %v1422_v28  ;;  %v760_v1 = vpop.xlane.xlu0 %759 }
 0x2a0   :  { %1433 = vpow2.f32 %v847_v19  ;;  %v2203_v58 = vsub.f32 %v2079_v44, %v760_v1 }
 0x2a1   :  { %v1424_v31 = vpop.eup %1423  ;;  %v853_v48 = vmul.f32 1.442695, %v2199_v56 }
 0x2a2   :  { %v1426_v60 = vpop.eup %1425  ;;  %905 = vadd.xlane.f32.xlu1 %v1424_v31  ;;  %v762_v62 = vpop.xlane.xlu1 %761  ;;  %v855_v37 = vmul.f32 1.442695, %v2203_v58 }
 0x2a3   :  { %1435 = vpow2.f32 %v853_v48  ;;  %v2207_v5 = vsub.f32 %v2074_v40, %v762_v62  ;;  %903 = vadd.xlane.f32.xlu0 %v1426_v60 }
 0x2a4   :  { %1437 = vpow2.f32 %v851_v38 }
 0x2a5   :  { %v1428_v61 = vpop.eup %1427  ;;  %v857_v6 = vmul.f32 1.442695, %v2207_v5 }
 0x2a6   :  { %v1430_v0 = vpop.eup %1429  ;;  %909 = vadd.xlane.f32.xlu1 %v1428_v61 }
 0x2a7   :  { %1439 = vpow2.f32 %v857_v6  ;;  %907 = vadd.xlane.f32.xlu0 %v1430_v0 }
 0x2a8   :  { %1441 = vpow2.f32 %v855_v37 }
 0x2a9   :  { %v1432_v44 = vpop.eup %1431 }
 0x2aa   :  { %v1434_v45 = vpop.eup %1433  ;;  %913 = vadd.xlane.f32.xlu1 %v1432_v44 }
 0x2ab   :  { %911 = vadd.xlane.f32.xlu0 %v1434_v45 }
 0x2ad   :  { %v1436_v46 = vpop.eup %1435 }
 0x2ae   :  { %v1438_v12 = vpop.eup %1437  ;;  %917 = vadd.xlane.f32.xlu1 %v1436_v46 }
 0x2af   :  { %915 = vadd.xlane.f32.xlu0 %v1438_v12 }
 0x2b1   :  { %v1440_v40 = vpop.eup %1439 }
 0x2b2   :  { %v1442_v51 = vpop.eup %1441  ;;  %921 = vadd.xlane.f32.xlu1 %v1440_v40 }
 0x2b3   :  { %919 = vadd.xlane.f32.xlu0 %v1442_v51 }
 0x2ff   :  { %v862_v17 = vpop.xlane.xlu1 %861 }
 0x300   :  { %1443 = vlog2.f32 %v862_v17 }
 0x303   :  { %v866_v57 = vpop.xlane.xlu1 %865 }
 0x304   :  { %1445 = vlog2.f32 %v866_v57  ;;  %v860_v59 = vpop.xlane.xlu0 %859 }
 0x305   :  { %1447 = vlog2.f32 %v860_v59 }
 0x308   :  { %v864_v63 = vpop.xlane.xlu0 %863 }
 0x309   :  { %1449 = vlog2.f32 %v864_v63 }
 0x30a   :  { %v1444_v23 = vpop.eup %1443 }
 0x30b   :  { %v926_v42 = vmul.f32 0.6931472, %v1444_v23  ;;  %v870_v25 = vpop.xlane.xlu1 %869 }
 0x30c   :  { %1451 = vlog2.f32 %v870_v25  ;;  %v868_v9 = vpop.xlane.xlu0 %867 }
 0x30d   :  { %v988_v20 = vsub.f32 %v2084_v3, %v926_v42  ;;  %1453 = vlog2.f32 %v868_v9 }
 0x30e   :  { %v1446_v16 = vpop.eup %1445 }
 0x30f   :  { %v1448_v14 = vpop.eup %1447  ;;  %1020 = vst [vmem:[%s2346_s7 + $0x8] sm:$0xff] %v988_v20  ;;  %v930_v19 = vmul.f32 0.6931472, %v1446_v16  ;;  %v874_v54 = vpop.xlane.xlu1 %873 }
 0x310   :  { %v924_v24 = vmul.f32 0.6931472, %v1448_v14  ;;  %1455 = vlog2.f32 %v874_v54  ;;  %v872_v28 = vpop.xlane.xlu0 %871 }
 0x311   :  { %v990_v27 = vsub.f32 %v2088_v52, %v930_v19  ;;  %1457 = vlog2.f32 %v872_v28 }
 0x312   :  { %v987_v1 = vsub.f32 %v2091_v2, %v924_v24 }
 0x313   :  { %v1450_v38 = vpop.eup %1449  ;;  %1022 = vst [vmem:[%s2346_s7 + $0x18] sm:$0xff] %v990_v27  ;;  %v878_v3 = vpop.xlane.xlu1 %877 }
 0x314   :  { %1019 = vst [vmem:[%s2346_s7] sm:$0xff] %v987_v1  ;;  %v928_v31 = vmul.f32 0.6931472, %v1450_v38  ;;  %1459 = vlog2.f32 %v878_v3  ;;  %v876_v48 = vpop.xlane.xlu0 %875 }
 0x315   :  { %1461 = vlog2.f32 %v876_v48 }
 0x316   :  { %v1452_v60 = vpop.eup %1451  ;;  %v989_v52 = vsub.f32 %v2096_v7, %v928_v31 }
 0x317   :  { %v1454_v62 = vpop.eup %1453  ;;  %v934_v37 = vmul.f32 0.6931472, %v1452_v60  ;;  %v882_v2 = vpop.xlane.xlu1 %881 }
 0x318   :  { %1021 = vst [vmem:[%s2346_s7 + $0x10] sm:$0xff] %v989_v52  ;;  %v932_v61 = vmul.f32 0.6931472, %v1454_v62  ;;  %1463 = vlog2.f32 %v882_v2  ;;  %v880_v6 = vpop.xlane.xlu0 %879 }
 0x319   :  { %v992_v0 = vsub.f32 %v2103_v15, %v934_v37  ;;  %1465 = vlog2.f32 %v880_v6 }
 0x31a   :  { %v1456_v44 = vpop.eup %1455  ;;  %v991_v45 = vsub.f32 %v2099_v4, %v932_v61 }
 0x31b   :  { %v1458_v46 = vpop.eup %1457  ;;  %1024 = vst [vmem:[%s2346_s7 + $0x28] sm:$0xff] %v992_v0  ;;  %v938_v7 = vmul.f32 0.6931472, %v1456_v44  ;;  %v886_v12 = vpop.xlane.xlu1 %885 }
 0x31c   :  { %1023 = vst [vmem:[%s2346_s7 + $0x20] sm:$0xff] %v991_v45  ;;  %v936_v40 = vmul.f32 0.6931472, %v1458_v46  ;;  %1467 = vlog2.f32 %v886_v12  ;;  %v884_v51 = vpop.xlane.xlu0 %883 }
 0x31d   :  { %v994_v15 = vsub.f32 %v2111_v22, %v938_v7  ;;  %1469 = vlog2.f32 %v884_v51 }
 0x31e   :  { %v1460_v17 = vpop.eup %1459  ;;  %v993_v4 = vsub.f32 %v2107_v11, %v936_v40 }
 0x31f   :  { %v1462_v57 = vpop.eup %1461  ;;  %1026 = vst [vmem:[%s2346_s7 + $0x38] sm:$0xff] %v994_v15  ;;  %v942_v59 = vmul.f32 0.6931472, %v1460_v17  ;;  %v890_v63 = vpop.xlane.xlu1 %889 }
 0x320   :  { %1025 = vst [vmem:[%s2346_s7 + $0x30] sm:$0xff] %v993_v4  ;;  %v940_v23 = vmul.f32 0.6931472, %v1462_v57  ;;  %1471 = vlog2.f32 %v890_v63  ;;  %v888_v42 = vpop.xlane.xlu0 %887 }
 0x321   :  { %v996_v22 = vsub.f32 %v2119_v10, %v942_v59  ;;  %1473 = vlog2.f32 %v888_v42 }
 0x322   :  { %v1464_v25 = vpop.eup %1463  ;;  %v995_v11 = vsub.f32 %v2115_v21, %v940_v23 }
 0x323   :  { %v1466_v9 = vpop.eup %1465  ;;  %1028 = vst [vmem:[%s2346_s7 + $0x48] sm:$0xff] %v996_v22  ;;  %v946_v20 = vmul.f32 0.6931472, %v1464_v25  ;;  %v894_v16 = vpop.xlane.xlu1 %893 }
 0x324   :  { %1027 = vst [vmem:[%s2346_s7 + $0x40] sm:$0xff] %v995_v11  ;;  %v944_v14 = vmul.f32 0.6931472, %v1466_v9  ;;  %1475 = vlog2.f32 %v894_v16  ;;  %v892_v19 = vpop.xlane.xlu0 %891 }
 0x325   :  { %v998_v10 = vsub.f32 %v2127_v30, %v946_v20  ;;  %1477 = vlog2.f32 %v892_v19 }
 0x326   :  { %v1468_v54 = vpop.eup %1467  ;;  %v997_v21 = vsub.f32 %v2123_v55, %v944_v14 }
 0x327   :  { %v1470_v24 = vpop.eup %1469  ;;  %1030 = vst [vmem:[%s2346_s7 + $0x58] sm:$0xff] %v998_v10  ;;  %v950_v28 = vmul.f32 0.6931472, %v1468_v54  ;;  %v898_v27 = vpop.xlane.xlu1 %897 }
 0x328   :  { %1029 = vst [vmem:[%s2346_s7 + $0x50] sm:$0xff] %v997_v21  ;;  %v948_v1 = vmul.f32 0.6931472, %v1470_v24  ;;  %1479 = vlog2.f32 %v898_v27  ;;  %v896_v38 = vpop.xlane.xlu0 %895 }
 0x329   :  { %v1000_v30 = vsub.f32 %v2135_v49, %v950_v28  ;;  %1481 = vlog2.f32 %v896_v38 }
 0x32a   :  { %v1472_v3 = vpop.eup %1471  ;;  %v999_v55 = vsub.f32 %v2131_v35, %v948_v1 }
 0x32b   :  { %v1474_v31 = vpop.eup %1473  ;;  %1032 = vst [vmem:[%s2346_s7 + $0x68] sm:$0xff] %v1000_v30  ;;  %v954_v48 = vmul.f32 0.6931472, %v1472_v3  ;;  %v902_v60 = vpop.xlane.xlu1 %901 }
 0x32c   :  { %1031 = vst [vmem:[%s2346_s7 + $0x60] sm:$0xff] %v999_v55  ;;  %v952_v52 = vmul.f32 0.6931472, %v1474_v31  ;;  %1483 = vlog2.f32 %v902_v60  ;;  %v900_v62 = vpop.xlane.xlu0 %899 }
 0x32d   :  { %v1002_v49 = vsub.f32 %v2143_v13, %v954_v48  ;;  %1485 = vlog2.f32 %v900_v62 }
 0x32e   :  { %v1476_v37 = vpop.eup %1475  ;;  %v1001_v35 = vsub.f32 %v2139_v53, %v952_v52 }
 0x32f   :  { %v1478_v2 = vpop.eup %1477  ;;  %1034 = vst [vmem:[%s2346_s7 + $0x78] sm:$0xff] %v1002_v49  ;;  %v958_v61 = vmul.f32 0.6931472, %v1476_v37  ;;  %v906_v6 = vpop.xlane.xlu1 %905 }
 0x330   :  { %1033 = vst [vmem:[%s2346_s7 + $0x70] sm:$0xff] %v1001_v35  ;;  %v956_v0 = vmul.f32 0.6931472, %v1478_v2  ;;  %1487 = vlog2.f32 %v906_v6  ;;  %v904_v44 = vpop.xlane.xlu0 %903 }
 0x331   :  { %v1004_v13 = vsub.f32 %v2151_v18, %v958_v61  ;;  %1489 = vlog2.f32 %v904_v44 }
 0x332   :  { %v1480_v45 = vpop.eup %1479  ;;  %v1003_v53 = vsub.f32 %v2147_v8, %v956_v0 }
 0x333   :  { %v1482_v46 = vpop.eup %1481  ;;  %1036 = vst [vmem:[%s2346_s7 + $0x88] sm:$0xff] %v1004_v13  ;;  %v962_v7 = vmul.f32 0.6931472, %v1480_v45  ;;  %v910_v12 = vpop.xlane.xlu1 %909 }
 0x334   :  { %1035 = vst [vmem:[%s2346_s7 + $0x80] sm:$0xff] %v1003_v53  ;;  %v960_v40 = vmul.f32 0.6931472, %v1482_v46  ;;  %1491 = vlog2.f32 %v910_v12  ;;  %v908_v51 = vpop.xlane.xlu0 %907 }
 0x335   :  { %v1006_v18 = vsub.f32 %v2159_v29, %v962_v7  ;;  %1493 = vlog2.f32 %v908_v51 }
 0x336   :  { %v1484_v15 = vpop.eup %1483  ;;  %v1005_v8 = vsub.f32 %v2155_v26, %v960_v40 }
 0x337   :  { %v1486_v17 = vpop.eup %1485  ;;  %1038 = vst [vmem:[%s2346_s7 + $0x98] sm:$0xff] %v1006_v18  ;;  %v966_v4 = vmul.f32 0.6931472, %v1484_v15  ;;  %v914_v57 = vpop.xlane.xlu1 %913 }
 0x338   :  { %1037 = vst [vmem:[%s2346_s7 + $0x90] sm:$0xff] %v1005_v8  ;;  %v964_v59 = vmul.f32 0.6931472, %v1486_v17  ;;  %1495 = vlog2.f32 %v914_v57  ;;  %v912_v63 = vpop.xlane.xlu0 %911 }
 0x339   :  { %v1008_v29 = vsub.f32 %v2167_v33, %v966_v4  ;;  %1497 = vlog2.f32 %v912_v63 }
 0x33a   :  { %v1488_v23 = vpop.eup %1487  ;;  %v1007_v26 = vsub.f32 %v2163_v43, %v964_v59 }
 0x33b   :  { %v1490_v42 = vpop.eup %1489  ;;  %1040 = vst [vmem:[%s2346_s7 + $0xa8] sm:$0xff] %v1008_v29  ;;  %v970_v22 = vmul.f32 0.6931472, %v1488_v23  ;;  %v918_v25 = vpop.xlane.xlu1 %917 }
 0x33c   :  { %1039 = vst [vmem:[%s2346_s7 + $0xa0] sm:$0xff] %v1007_v26  ;;  %v968_v11 = vmul.f32 0.6931472, %v1490_v42  ;;  %1499 = vlog2.f32 %v918_v25  ;;  %v916_v9 = vpop.xlane.xlu0 %915 }
 0x33d   :  { %v1010_v33 = vsub.f32 %v2175_v32, %v970_v22  ;;  %1501 = vlog2.f32 %v916_v9 }
 0x33e   :  { %v1492_v20 = vpop.eup %1491  ;;  %v1009_v43 = vsub.f32 %v2171_v36, %v968_v11 }
 0x33f   :  { %v1494_v16 = vpop.eup %1493  ;;  %1042 = vst [vmem:[%s2346_s7 + $0xb8] sm:$0xff] %v1010_v33  ;;  %v974_v14 = vmul.f32 0.6931472, %v1492_v20  ;;  %v922_v19 = vpop.xlane.xlu1 %921 }
 0x340   :  { %1041 = vst [vmem:[%s2346_s7 + $0xb0] sm:$0xff] %v1009_v43  ;;  %v972_v10 = vmul.f32 0.6931472, %v1494_v16  ;;  %1503 = vlog2.f32 %v922_v19  ;;  %v920_v54 = vpop.xlane.xlu0 %919 }
 0x341   :  { %v1012_v32 = vsub.f32 %v2183_v39, %v974_v14  ;;  %1505 = vlog2.f32 %v920_v54 }
 0x342   :  { %v1496_v21 = vpop.eup %1495  ;;  %v1011_v36 = vsub.f32 %v2179_v34, %v972_v10 }
 0x343   :  { %v1498_v24 = vpop.eup %1497  ;;  %1044 = vst [vmem:[%s2346_s7 + $0xc8] sm:$0xff] %v1012_v32  ;;  %v978_v28 = vmul.f32 0.6931472, %v1496_v21 }
 0x344   :  { %1043 = vst [vmem:[%s2346_s7 + $0xc0] sm:$0xff] %v1011_v36  ;;  %v976_v27 = vmul.f32 0.6931472, %v1498_v24 }
 0x345   :  { %v1014_v1 = vsub.f32 %v2191_v47, %v978_v28 }
 0x346   :  { %v1500_v38 = vpop.eup %1499  ;;  %v1013_v39 = vsub.f32 %v2187_v41, %v976_v27 }
 0x347   :  { %v1502_v30 = vpop.eup %1501  ;;  %1046 = vst [vmem:[%s2346_s7 + $0xd8] sm:$0xff] %v1014_v1  ;;  %v982_v34 = vmul.f32 0.6931472, %v1500_v38 }
 0x348   :  { %1045 = vst [vmem:[%s2346_s7 + $0xd0] sm:$0xff] %v1013_v39  ;;  %v980_v3 = vmul.f32 0.6931472, %v1502_v30 }
 0x349   :  { %v1016_v55 = vsub.f32 %v2199_v56, %v982_v34 }
 0x34a   :  { %v1504_v31 = vpop.eup %1503  ;;  %v1015_v48 = vsub.f32 %v2195_v50, %v980_v3 }
 0x34b   :  { %v1506_v47 = vpop.eup %1505  ;;  %1048 = vst [vmem:[%s2346_s7 + $0xe8] sm:$0xff] %v1016_v55  ;;  %v986_v41 = vmul.f32 0.6931472, %v1504_v31 }
 0x34c   :  { %1047 = vst [vmem:[%s2346_s7 + $0xe0] sm:$0xff] %v1015_v48  ;;  %v984_v60 = vmul.f32 0.6931472, %v1506_v47 }
 0x34d   :  { %v1018_v52 = vsub.f32 %v2207_v5, %v986_v41 }
 0x34e   :  { %v1017_v62 = vsub.f32 %v2203_v58, %v984_v60 }
 0x34f   :  { %1050 = vst [vmem:[%s2346_s7 + $0xf8] sm:$0xff] %v1018_v52 }
 0x350   :  { %1049 = vst [vmem:[%s2346_s7 + $0xf0] sm:$0xff] %v1017_v62 }

// kernel: gin_forward.3
= control target key start
LH: loop header
LB: loop body
LE: loop exit
PB: predicated region body
PF: predicated region fallthrough
CT: control target
= control target key end

     0   :  { %v1845_v0 = vmov 0.0|0.0   ;;  %vm1458_vm0 = vcmask 1040384   ;;  %vm1460_vm1 = vcmask 1041408   ;;  %s2418_s1 = inlined_call_operand.vmem [shape: f32[256,128], index: 1, kind: input, shape index: {}]   ;;  %s2419_s2 = inlined_call_operand.vmem [shape: f32[1,128], index: 2, kind: input, shape index: {}]   ;;  %s2420_s3 = inlined_call_operand.vmem [shape: f32[1,128], index: 3, kind: input, shape index: {}]   ;;  %s2421_s0 = inlined_call_operand.vmem [shape: bf16[256,256], index: 0, kind: input, shape index: {}]   ;;  %s2422_s4 = inlined_call_operand.vmem [shape: f32[128,128], index: 4, kind: input, shape index: {}]   ;;  %s2423_s6 = inlined_call_operand.vmem [shape: f32[128,128], index: 6, kind: input, shape index: {}]   ;;  %s2424_s5 = inlined_call_operand.vmem [shape: f32[1,128], index: 5, kind: input, shape index: {}]   ;;  %s2425_s8 = inlined_call_operand.vmem [shape: f32[256,128], index: 8, kind: output, shape index: {0}]   ;;  %s2426_s7 = inlined_call_operand.vmem [shape: f32[1,128], index: 7, kind: input, shape index: {}]   ;;  %s2427_s9 = inlined_call_operand.vmem [shape: f32[1,8,128], index: 9, kind: output, shape index: {1}]  }
   0x1   :  { %1731 = vmatprep.subr.bf16.mxu0 %v1845_v0  ;;  %v67_v1 = vld [vmem:[%s2418_s1] sm:$0xff]  ;;  %v68_v2 = vld [vmem:[%s2418_s1 + $0x8] sm:$0xff]  ;;  %v69_v7 = vld [vmem:[%s2418_s1 + $0x10] sm:$0xff] }
   0x2   :  { %v1907_v3 = vld [vmem:[%s2419_s2] ss:$0 sm:$0xff]  ;;  %v70_v8 = vld [vmem:[%s2418_s1 + $0x18] sm:$0xff]  ;;  %v72_v12 = vld [vmem:[%s2418_s1 + $0x28] sm:$0xff] }
   0x3   :  { %v106_v4 = vmul.f32 %v1907_v3, %v67_v1  ;;  %v107_v5 = vmul.f32 %v1907_v3, %v68_v2  ;;  %v1914_v6 = vld [vmem:[%s2420_s3] ss:$0 sm:$0xff]  ;;  %v108_v9 = vmul.f32 %v1907_v3, %v69_v7  ;;  %v109_v10 = vmul.f32 %v1907_v3, %v70_v8  ;;  %v73_v17 = vld [vmem:[%s2418_s1 + $0x30] sm:$0xff]  ;;  %v74_v20 = vld [vmem:[%s2418_s1 + $0x38] sm:$0xff] }
   0x4   :  { %v71_v11 = vld [vmem:[%s2418_s1 + $0x20] sm:$0xff]  ;;  %v111_v16 = vmul.f32 %v1907_v3, %v72_v12  ;;  %v112_v22 = vmul.f32 %v1907_v3, %v73_v17  ;;  %v113_v26 = vmul.f32 %v1907_v3, %v74_v20  ;;  %v76_v28 = vld [vmem:[%s2418_s1 + $0x48] sm:$0xff]  ;;  %v77_v34 = vld [vmem:[%s2418_s1 + $0x50] sm:$0xff] }
   0x5   :  { %v145_v13 = vadd.f32 %v1914_v6, %v106_v4  ;;  %v146_v14 = vadd.f32 %v1914_v6, %v107_v5  ;;  %v110_v15 = vmul.f32 %v1907_v3, %v71_v11  ;;  %v147_v18 = vadd.f32 %v1914_v6, %v108_v9  ;;  %v75_v27 = vld [vmem:[%s2418_s1 + $0x40] sm:$0xff]  ;;  %v78_v35 = vld [vmem:[%s2418_s1 + $0x58] sm:$0xff]  ;;  %v80_v42 = vld [vmem:[%s2418_s1 + $0x68] sm:$0xff] }
   0x6   :  { %v148_v19 = vadd.f32 %v1914_v6, %v109_v10  ;;  %v150_v25 = vadd.f32 %v1914_v6, %v111_v16  ;;  %v114_v29 = vmul.f32 %v1907_v3, %v75_v27  ;;  %v151_v31 = vadd.f32 %v1914_v6, %v112_v22  ;;  %v79_v41 = vld [vmem:[%s2418_s1 + $0x60] sm:$0xff]  ;;  %v81_v49 = vld [vmem:[%s2418_s1 + $0x70] sm:$0xff]  ;;  %v82_v50 = vld [vmem:[%s2418_s1 + $0x78] sm:$0xff] }
   0x7   :  { %v1732_v21 = vpack.c.bf16 %v146_v14, %v145_v13  ;;  %v149_v24 = vadd.f32 %v1914_v6, %v110_v15  ;;  %v152_v32 = vadd.f32 %v1914_v6, %v113_v26  ;;  %v115_v33 = vmul.f32 %v1907_v3, %v76_v28  ;;  %v1979_v44 = vld [vmem:[%s2421_s0] sm:$0xff]  ;;  %v84_v58 = vld [vmem:[%s2418_s1 + $0x88] sm:$0xff]  ;;  %v85_v1 = vld [vmem:[%s2418_s1 + $0x90] sm:$0xff] }
   0x8   :  { %v1735_v23 = vpack.c.bf16 %v148_v19, %v147_v18  ;;  %v153_v36 = vadd.f32 %v1914_v6, %v114_v29  ;;  %v116_v39 = vmul.f32 %v1907_v3, %v77_v34  ;;  %v117_v40 = vmul.f32 %v1907_v3, %v78_v35  ;;  %v83_v57 = vld [vmem:[%s2418_s1 + $0x80] sm:$0xff]  ;;  %v86_v2 = vld [vmem:[%s2418_s1 + $0x98] sm:$0xff]  ;;  %v88_v11 = vld [vmem:[%s2418_s1 + $0xa8] sm:$0xff] }
   0x9   :  { %1733 = vmatpush1.bf16.msra.mxu0 %v1732_v21  ;;  %v1738_v30 = vpack.c.bf16 %v150_v25, %v149_v24  ;;  %v1741_v37 = vpack.c.bf16 %v152_v32, %v151_v31  ;;  %v154_v38 = vadd.f32 %v1914_v6, %v115_v33  ;;  %v118_v43 = vmul.f32 %v1907_v3, %v79_v41  ;;  %v87_v10 = vld [vmem:[%s2418_s1 + $0xa0] sm:$0xff]  ;;  %v89_v17 = vld [vmem:[%s2418_s1 + $0xb0] sm:$0xff]  ;;  %v90_v18 = vld [vmem:[%s2418_s1 + $0xb8] sm:$0xff] }
   0xa   :  { %1734 = vmatprep.subr.bf16.mxu0 %v1845_v0  ;;  %v155_v46 = vadd.f32 %v1914_v6, %v116_v39  ;;  %v156_v47 = vadd.f32 %v1914_v6, %v117_v40  ;;  %v119_v48 = vmul.f32 %v1907_v3, %v80_v42  ;;  %v210_v51 = vunpack.c.h.bf16 %v1979_v44  ;;  %v91_v24 = vld [vmem:[%s2418_s1 + $0xc0] sm:$0xff]  ;;  %v92_v25 = vld [vmem:[%s2418_s1 + $0xc8] sm:$0xff]  ;;  %v93_v31 = vld [vmem:[%s2418_s1 + $0xd0] sm:$0xff] }
   0xb   :  { %v1744_v45 = vpack.c.bf16 %v154_v38, %v153_v36  ;;  %v120_v52 = vmul.f32 %v1907_v3, %v81_v49  ;;  %v121_v53 = vmul.f32 %v1907_v3, %v82_v50  ;;  %v157_v55 = vadd.f32 %v1914_v6, %v118_v43  ;;  %v94_v32 = vld [vmem:[%s2418_s1 + $0xd8] sm:$0xff]  ;;  %v95_v38 = vld [vmem:[%s2418_s1 + $0xe0] sm:$0xff]  ;;  %v96_v39 = vld [vmem:[%s2418_s1 + $0xe8] sm:$0xff] }
   0xc   :  { %v1747_v54 = vpack.c.bf16 %v156_v47, %v155_v46  ;;  %v158_v56 = vadd.f32 %v1914_v6, %v119_v48  ;;  %369 = vmatprep.mubr.f32.mxu0 %v210_v51  ;;  %v122_v59 = vmul.f32 %v1907_v3, %v83_v57  ;;  %v123_v63 = vmul.f32 %v1907_v3, %v84_v58  ;;  %v97_v46 = vld [vmem:[%s2418_s1 + $0xf0] sm:$0xff]  ;;  %v98_v47 = vld [vmem:[%s2418_s1 + $0xf8] sm:$0xff]  ;;  %v178_v57 = vld [vmem:[%s2421_s0 + $0x8] sm:$0xff] }
   0xd   :  { %1736 = vmatpush1.bf16.msra.mxu0 %v1735_v23  ;;  %v159_v61 = vadd.f32 %v1914_v6, %v120_v52  ;;  %v160_v62 = vadd.f32 %v1914_v6, %v121_v53  ;;  %v124_v8 = vmul.f32 %v1907_v3, %v85_v1  ;;  %v125_v9 = vmul.f32 %v1907_v3, %v86_v2  ;;  %v634_v1 = vld [vmem:[%s2422_s4 + $0x28] sm:$0xff] }
   0xe   :  { %1737 = vmatprep.subr.bf16.mxu0 %v1845_v0  ;;  %v1750_v60 = vpack.c.bf16 %v158_v56, %v157_v55  ;;  %v161_v4 = vadd.f32 %v1914_v6, %v122_v59  ;;  %v162_v7 = vadd.f32 %v1914_v6, %v123_v63  ;;  %v126_v12 = vmul.f32 %v1907_v3, %v87_v10  ;;  %v629_v59 = vld [vmem:[%s2422_s4] sm:$0xff] }
   0xf   :  { %v1753_v5 = vpack.c.bf16 %v160_v62, %v159_v61  ;;  %v163_v14 = vadd.f32 %v1914_v6, %v124_v8  ;;  %v164_v15 = vadd.f32 %v1914_v6, %v125_v9  ;;  %v127_v16 = vmul.f32 %v1907_v3, %v88_v11  ;;  %v633_v63 = vld [vmem:[%s2422_s4 + $0x20] sm:$0xff]  ;;  %v635_v8 = vld [vmem:[%s2422_s4 + $0x30] sm:$0xff]  ;;  %v636_v9 = vld [vmem:[%s2422_s4 + $0x38] sm:$0xff] }
  0x10   :  { %v1756_v13 = vpack.c.bf16 %v162_v7, %v161_v4  ;;  %v128_v19 = vmul.f32 %v1907_v3, %v89_v17  ;;  %v165_v21 = vadd.f32 %v1914_v6, %v126_v12  ;;  %v129_v23 = vmul.f32 %v1907_v3, %v90_v18  ;;  %v181_v12 = vld [vmem:[%s2421_s0 + $0x20] sm:$0xff]  ;;  %v182_v18 = vld [vmem:[%s2421_s0 + $0x28] sm:$0xff] }
  0x11   :  { %1739 = vmatpush1.bf16.msra.mxu0 %v1738_v30  ;;  %v1759_v20 = vpack.c.bf16 %v164_v15, %v163_v14  ;;  %v166_v22 = vadd.f32 %v1914_v6, %v127_v16  ;;  %v130_v26 = vmul.f32 %v1907_v3, %v91_v24  ;;  %v131_v30 = vmul.f32 %v1907_v3, %v92_v25  ;;  %v637_v14 = vld [vmem:[%s2422_s4 + $0x40] sm:$0xff]  ;;  %v638_v15 = vld [vmem:[%s2422_s4 + $0x48] sm:$0xff]  ;;  %v183_v24 = vld [vmem:[%s2421_s0 + $0x30] sm:$0xff] }
  0x12   :  { %1740 = vmatprep.subr.bf16.mxu0 %v1845_v0  ;;  %v167_v28 = vadd.f32 %v1914_v6, %v128_v19  ;;  %v168_v29 = vadd.f32 %v1914_v6, %v129_v23  ;;  %v132_v36 = vmul.f32 %v1907_v3, %v93_v31  ;;  %v134_v40 = vmul.f32 %v1907_v3, %v95_v38 }
  0x13   :  { %v1762_v27 = vpack.c.bf16 %v166_v22, %v165_v21  ;;  %v169_v33 = vadd.f32 %v1914_v6, %v130_v26  ;;  %v170_v35 = vadd.f32 %v1914_v6, %v131_v30  ;;  %v136_v48 = vmul.f32 %v1907_v3, %v97_v46  ;;  %v640_v21 = vld [vmem:[%s2422_s4 + $0x58] sm:$0xff]  ;;  %v641_v26 = vld [vmem:[%s2422_s4 + $0x60] sm:$0xff] }
  0x14   :  { %v1765_v34 = vpack.c.bf16 %v168_v29, %v167_v28  ;;  %v171_v42 = vadd.f32 %v1914_v6, %v132_v36  ;;  %v173_v50 = vadd.f32 %v1914_v6, %v134_v40  ;;  %v137_v52 = vmul.f32 %v1907_v3, %v98_v47  ;;  %v184_v30 = vld [vmem:[%s2421_s0 + $0x38] sm:$0xff]  ;;  %v187_v40 = vld [vmem:[%s2421_s0 + $0x50] sm:$0xff]  ;;  %v189_v47 = vld [vmem:[%s2421_s0 + $0x60] sm:$0xff] }
  0x15   :  { %1742 = vmatpush1.bf16.msra.mxu0 %v1741_v37  ;;  %v133_v37 = vmul.f32 %v1907_v3, %v94_v32  ;;  %v1768_v41 = vpack.c.bf16 %v170_v35, %v169_v33  ;;  %v212_v58 = vunpack.c.h.bf16 %v178_v57  ;;  %v211_v2 = vunpack.c.l.bf16 %v178_v57 }
  0x16   :  { %1743 = vmatprep.subr.bf16.mxu0 %v1845_v0  ;;  %v176_v55 = vadd.f32 %v1914_v6, %v137_v52  ;;  %v1787_v7 = vpack.c.bf16 %v634_v1, %v633_v63  ;;  %v218_v17 = vunpack.c.h.bf16 %v181_v12  ;;  %v1795_v19 = vpack.c.bf16 %v638_v15, %v637_v14  ;;  %v196_v1 = vld [vmem:[%s2421_s0 + $0x98] sm:$0xff]  ;;  %v643_v15 = vld [vmem:[%s2422_s4 + $0x70] sm:$0xff] }
  0x17   :  { %v172_v43 = vadd.f32 %v1914_v6, %v133_v37  ;;  %v217_v22 = vunpack.c.l.bf16 %v181_v12  ;;  %v220_v23 = vunpack.c.h.bf16 %v182_v18  ;;  %v219_v28 = vunpack.c.l.bf16 %v182_v18  ;;  %v186_v37 = vld [vmem:[%s2421_s0 + $0x48] sm:$0xff]  ;;  %v199_v12 = vld [vmem:[%s2421_s0 + $0xb0] sm:$0xff] }
  0x18   :  { %v222_v29 = vunpack.c.h.bf16 %v183_v24  ;;  %v221_v32 = vunpack.c.l.bf16 %v183_v24  ;;  %v224_v33 = vunpack.c.h.bf16 %v184_v30  ;;  %v223_v35 = vunpack.c.l.bf16 %v184_v30  ;;  %v202_v24 = vld [vmem:[%s2421_s0 + $0xc8] sm:$0xff]  ;;  %v204_v30 = vld [vmem:[%s2421_s0 + $0xd8] sm:$0xff] }
  0x19   :  { %1745 = vmatpush1.bf16.msra.mxu0 %v1744_v45  ;;  %v135_v45 = vmul.f32 %v1907_v3, %v96_v39  ;;  %v1771_v49 = vpack.c.bf16 %v172_v43, %v171_v42  ;;  %v209_v3 = vunpack.c.l.bf16 %v1979_v44  ;;  %v632_v44 = vld [vmem:[%s2422_s4 + $0x18] sm:$0xff]  ;;  %v228_v39 = vunpack.c.h.bf16 %v186_v37 }
  0x1a   :  { %1746 = vmatprep.subr.bf16.mxu0 %v1845_v0  ;;  %v230_v42 = vunpack.c.h.bf16 %v187_v40  ;;  %v188_v43 = vld [vmem:[%s2421_s0 + $0x58] sm:$0xff]  ;;  %v254_v14 = vunpack.c.h.bf16 %v199_v12 }
  0x1b   :  { %v174_v51 = vadd.f32 %v1914_v6, %v135_v45  ;;  %v229_v45 = vunpack.c.l.bf16 %v187_v40  ;;  %v232_v46 = vunpack.c.h.bf16 %v188_v43 }
  0x1d   :  { %1748 = vmatpush1.bf16.msra.mxu0 %v1747_v54  ;;  %v1774_v53 = vpack.c.bf16 %v174_v51, %v173_v50  ;;  %v175_v54 = vadd.f32 %v1914_v6, %v136_v48  ;;  %v630_v6 = vld [vmem:[%s2422_s4 + $0x8] sm:$0xff]  ;;  %v231_v48 = vunpack.c.l.bf16 %v188_v43  ;;  %v233_v51 = vunpack.c.l.bf16 %v189_v47 }
  0x1e   :  { %1749 = vmatprep.subr.bf16.mxu0 %v1845_v0  ;;  %v1779_v61 = vpack.c.bf16 %v630_v6, %v629_v59  ;;  %v190_v50 = vld [vmem:[%s2421_s0 + $0x68] sm:$0xff] }
  0x1f   :  { %v1777_v56 = vpack.c.bf16 %v176_v55, %v175_v54  ;;  %v236_v52 = vunpack.c.h.bf16 %v190_v50  ;;  %v235_v54 = vunpack.c.l.bf16 %v190_v50 }
  0x20   :  { %1780 = vmatprep.subr.bf16.mxu1 %v1779_v61 }
  0x21   :  { %1751 = vmatpush1.bf16.msra.mxu0 %v1750_v60  ;;  %v179_v60 = vld [vmem:[%s2421_s0 + $0x10] sm:$0xff]  ;;  %1782 = vmatpush3.bf16.msra.mxu1 %v1779_v61 }
  0x22   :  { %1752 = vmatprep.subr.bf16.mxu0 %v1845_v0  ;;  %v214_v4 = vunpack.c.h.bf16 %v179_v60  ;;  %v213_v10 = vunpack.c.l.bf16 %v179_v60 }
  0x25   :  { %1754 = vmatpush1.bf16.msra.mxu0 %v1753_v5  ;;  %v180_v5 = vld [vmem:[%s2421_s0 + $0x18] sm:$0xff] }
  0x26   :  { %1755 = vmatprep.subr.bf16.mxu0 %v1845_v0  ;;  %v216_v11 = vunpack.c.h.bf16 %v180_v5  ;;  %v215_v16 = vunpack.c.l.bf16 %v180_v5  ;;  %v197_v5 = vld [vmem:[%s2421_s0 + $0xa0] sm:$0xff] }
  0x29   :  { %1757 = vmatpush1.bf16.msra.mxu0 %v1756_v13  ;;  %v1791_v13 = vpack.c.bf16 %v636_v9, %v635_v8  ;;  %v250_v8 = vunpack.c.h.bf16 %v197_v5  ;;  %v198_v9 = vld [vmem:[%s2421_s0 + $0xa8] sm:$0xff] }
  0x2a   :  { %1758 = vmatprep.subr.bf16.mxu0 %v1845_v0 }
  0x2d   :  { %1760 = vmatpush1.bf16.msra.mxu0 %v1759_v20  ;;  %v639_v20 = vld [vmem:[%s2422_s4 + $0x50] sm:$0xff] }
  0x2e   :  { %1761 = vmatprep.subr.bf16.mxu0 %v1845_v0  ;;  %v1799_v25 = vpack.c.bf16 %v640_v21, %v639_v20  ;;  %v201_v21 = vld [vmem:[%s2421_s0 + $0xc0] sm:$0xff] }
  0x31   :  { %1763 = vmatpush1.bf16.msra.mxu0 %v1762_v27  ;;  %v642_v27 = vld [vmem:[%s2422_s4 + $0x68] sm:$0xff] }
  0x32   :  { %1764 = vmatprep.subr.bf16.mxu0 %v1845_v0  ;;  %v1803_v31 = vpack.c.bf16 %v642_v27, %v641_v26  ;;  %v260_v26 = vunpack.c.h.bf16 %v202_v24  ;;  %v203_v27 = vld [vmem:[%s2421_s0 + $0xd0] sm:$0xff] }
  0x35   :  { %1766 = vmatpush1.bf16.msra.mxu0 %v1765_v34  ;;  %v185_v34 = vld [vmem:[%s2421_s0 + $0x40] sm:$0xff] }
  0x36   :  { %1767 = vmatprep.subr.bf16.mxu0 %v1845_v0  ;;  %v226_v36 = vunpack.c.h.bf16 %v185_v34  ;;  %v225_v38 = vunpack.c.l.bf16 %v185_v34  ;;  %v263_v34 = vunpack.c.l.bf16 %v204_v30 }
  0x39   :  { %1769 = vmatpush1.bf16.msra.mxu0 %v1768_v41  ;;  %v227_v41 = vunpack.c.l.bf16 %v186_v37 }
  0x3a   :  { %1770 = vmatprep.subr.bf16.mxu0 %v1845_v0 }
  0x3d   :  { %1772 = vmatpush1.bf16.msra.mxu0 %v1771_v49  ;;  %v234_v49 = vunpack.c.h.bf16 %v189_v47  ;;  %v909_v47 = vld [vmem:[%s2423_s6] sm:$0xff] }
  0x3e   :  { %1773 = vmatprep.subr.bf16.mxu0 %v1845_v0 }
  0x41   :  { %1775 = vmatpush1.bf16.msra.mxu0 %v1774_v53  ;;  %v191_v53 = vld [vmem:[%s2421_s0 + $0x70] sm:$0xff] }
  0x42   :  { %1776 = vmatprep.subr.bf16.mxu0 %v1845_v0  ;;  %v631_v0 = vld [vmem:[%s2422_s4 + $0x10] sm:$0xff]  ;;  %v238_v55 = vunpack.c.h.bf16 %v191_v53  ;;  %v237_v57 = vunpack.c.l.bf16 %v191_v53 }
  0x43   :  { %v1783_v62 = vpack.c.bf16 %v632_v44, %v631_v0  ;;  %v194_v0 = vld [vmem:[%s2421_s0 + $0x88] sm:$0xff]  ;;  %v195_v44 = vld [vmem:[%s2421_s0 + $0x90] sm:$0xff] }
  0x44   :  { %v244_v61 = vunpack.c.h.bf16 %v194_v0  ;;  %v246_v63 = vunpack.c.h.bf16 %v195_v44 }
  0x45   :  { %1778 = vmatpush1.bf16.msra.mxu0 %v1777_v56  ;;  %1784 = vmatprep.subr.bf16.mxu1 %v1783_v62  ;;  %v192_v56 = vld [vmem:[%s2421_s0 + $0x78] sm:$0xff] }
  0x46   :  { %1786 = vmatpush3.bf16.msra.mxu1 %v1783_v62  ;;  %v239_v59 = vunpack.c.l.bf16 %v192_v56  ;;  %v243_v62 = vunpack.c.l.bf16 %v194_v0  ;;  %v916_v0 = vld [vmem:[%s2423_s6 + $0x38] sm:$0xff] }
  0x47   :  { %1788 = vmatprep.subr.bf16.mxu1 %v1787_v7 }
  0x48   :  { %370 = vmatmul.mubr.f32.vlgmr.msra.gmra.mrb[0].mxu0 %v209_v3  ;;  %v240_v3 = vunpack.c.h.bf16 %v192_v56  ;;  %v913_v56 = vld [vmem:[%s2423_s6 + $0x20] sm:$0xff] }
  0x49   :  { %374 = vmatprep.mubr.f32.mxu0 %v212_v58  ;;  %v193_v58 = vld [vmem:[%s2421_s0 + $0x80] sm:$0xff] }
  0x4a   :  { %1790 = vmatpush3.bf16.msra.mxu1 %v1787_v7  ;;  %v242_v6 = vunpack.c.h.bf16 %v193_v58  ;;  %v241_v60 = vunpack.c.l.bf16 %v193_v58  ;;  %v247_v7 = vunpack.c.l.bf16 %v196_v1 }
  0x4b   :  { %1792 = vmatprep.subr.bf16.mxu1 %v1791_v13 }
  0x4c   :  { %375 = vmatmul.mubr.f32.gmra.mrb[2].mxu0 %v211_v2  ;;  %v245_v2 = vunpack.c.l.bf16 %v195_v44 }
  0x4d   :  { %379 = vmatprep.mubr.f32.mxu0 %v214_v4  ;;  %v248_v4 = vunpack.c.h.bf16 %v196_v1 }
  0x4e   :  { %1794 = vmatpush3.bf16.msra.mxu1 %v1791_v13  ;;  %v251_v13 = vunpack.c.l.bf16 %v198_v9 }
  0x4f   :  { %1796 = vmatprep.subr.bf16.mxu1 %v1795_v19 }
  0x50   :  { %380 = vmatmul.mubr.f32.gmra.mrb[4].mxu0 %v213_v10  ;;  %v249_v10 = vunpack.c.l.bf16 %v197_v5  ;;  %v919_v5 = vld [vmem:[%s2423_s6 + $0x50] sm:$0xff] }
  0x51   :  { %384 = vmatprep.mubr.f32.mxu0 %v216_v11  ;;  %v252_v11 = vunpack.c.h.bf16 %v198_v9 }
  0x52   :  { %1798 = vmatpush3.bf16.msra.mxu1 %v1795_v19  ;;  %v253_v19 = vunpack.c.l.bf16 %v199_v12  ;;  %v922_v12 = vld [vmem:[%s2423_s6 + $0x68] sm:$0xff] }
  0x53   :  { %1800 = vmatprep.subr.bf16.mxu1 %v1799_v25 }
  0x54   :  { %385 = vmatmul.mubr.f32.gmra.mrb[6].mxu0 %v215_v16  ;;  %v644_v16 = vld [vmem:[%s2422_s4 + $0x78] sm:$0xff] }
  0x55   :  { %389 = vmatprep.mubr.f32.mxu0 %v218_v17  ;;  %v200_v17 = vld [vmem:[%s2421_s0 + $0xb8] sm:$0xff]  ;;  %v1807_v18 = vpack.c.bf16 %v644_v16, %v643_v15 }
  0x56   :  { %1802 = vmatpush3.bf16.msra.mxu1 %v1799_v25  ;;  %v256_v20 = vunpack.c.h.bf16 %v200_v17  ;;  %v257_v25 = vunpack.c.l.bf16 %v201_v21 }
  0x57   :  { %1804 = vmatprep.subr.bf16.mxu1 %v1803_v31 }
  0x58   :  { %390 = vmatmul.mubr.f32.gmra.mrb[8].mxu0 %v217_v22  ;;  %v255_v22 = vunpack.c.l.bf16 %v200_v17 }
  0x59   :  { %394 = vmatprep.mubr.f32.mxu0 %v220_v23  ;;  %v258_v23 = vunpack.c.h.bf16 %v201_v21 }
  0x5a   :  { %1806 = vmatpush3.bf16.msra.mxu1 %v1803_v31  ;;  %v261_v31 = vunpack.c.l.bf16 %v203_v27 }
  0x5b   :  { %1808 = vmatprep.subr.bf16.mxu1 %v1807_v18 }
  0x5c   :  { %395 = vmatmul.mubr.f32.gmra.mrb[10].mxu0 %v219_v28  ;;  %v259_v28 = vunpack.c.l.bf16 %v202_v24 }
  0x5d   :  { %399 = vmatprep.mubr.f32.mxu0 %v222_v29  ;;  %v262_v29 = vunpack.c.h.bf16 %v203_v27 }
  0x5e   :  { %1810 = vmatpush3.bf16.msra.mxu1 %v1807_v18 }
  0x60   :  { %400 = vmatmul.mubr.f32.gmra.mrb[12].mxu0 %v221_v32  ;;  %v264_v32 = vunpack.c.h.bf16 %v204_v30 }
  0x61   :  { %404 = vmatprep.mubr.f32.mxu0 %v224_v33  ;;  %v205_v33 = vld [vmem:[%s2421_s0 + $0xe0] sm:$0xff] }
  0x62   :  { %v265_v37 = vunpack.c.l.bf16 %v205_v33 }
  0x64   :  { %405 = vmatmul.mubr.f32.gmra.mrb[14].mxu0 %v223_v35  ;;  %v266_v35 = vunpack.c.h.bf16 %v205_v33 }
  0x65   :  { %409 = vmatprep.mubr.f32.mxu0 %v226_v36  ;;  %v206_v36 = vld [vmem:[%s2421_s0 + $0xe8] sm:$0xff] }
  0x66   :  { %v267_v40 = vunpack.c.l.bf16 %v206_v36 }
  0x68   :  { %410 = vmatmul.mubr.f32.gmra.mrb[16].mxu0 %v225_v38  ;;  %v268_v38 = vunpack.c.h.bf16 %v206_v36 }
  0x69   :  { %414 = vmatprep.mubr.f32.mxu0 %v228_v39  ;;  %v207_v39 = vld [vmem:[%s2421_s0 + $0xf0] sm:$0xff] }
  0x6a   :  { %v269_v43 = vunpack.c.l.bf16 %v207_v39 }
  0x6c   :  { %415 = vmatmul.mubr.f32.gmra.mrb[18].mxu0 %v227_v41  ;;  %v270_v41 = vunpack.c.h.bf16 %v207_v39 }
  0x6d   :  { %419 = vmatprep.mubr.f32.mxu0 %v230_v42  ;;  %v208_v42 = vld [vmem:[%s2421_s0 + $0xf8] sm:$0xff] }
  0x70   :  { %420 = vmatmul.mubr.f32.gmra.mrb[20].mxu0 %v229_v45  ;;  %v272_v45 = vunpack.c.h.bf16 %v208_v42 }
  0x71   :  { %424 = vmatprep.mubr.f32.mxu0 %v232_v46  ;;  %v271_v46 = vunpack.c.l.bf16 %v208_v42 }
  0x74   :  { %425 = vmatmul.mubr.f32.gmra.mrb[22].mxu0 %v231_v48  ;;  %v910_v48 = vld [vmem:[%s2423_s6 + $0x8] sm:$0xff] }
  0x75   :  { %429 = vmatprep.mubr.f32.mxu0 %v234_v49  ;;  %v1811_v49 = vpack.c.bf16 %v910_v48, %v909_v47 }
  0x77   :  { %1812 = vmatprep.subr.bf16.mxu1 %v1811_v49 }
  0x78   :  { %430 = vmatmul.mubr.f32.gmra.mrb[24].mxu0 %v233_v51  ;;  %v911_v51 = vld [vmem:[%s2423_s6 + $0x10] sm:$0xff] }
  0x79   :  { %434 = vmatprep.mubr.f32.mxu0 %v236_v52  ;;  %v912_v52 = vld [vmem:[%s2423_s6 + $0x18] sm:$0xff] }
  0x7c   :  { %435 = vmatmul.mubr.f32.gmra.mrb[26].mxu0 %v235_v54  ;;  %v1815_v54 = vpack.c.bf16 %v912_v52, %v911_v51 }
  0x7d   :  { %439 = vmatprep.mubr.f32.mxu0 %v238_v55 }
  0x80   :  { %440 = vmatmul.mubr.f32.gmra.mrb[28].mxu0 %v237_v57  ;;  %v914_v57 = vld [vmem:[%s2423_s6 + $0x28] sm:$0xff] }
  0x81   :  { %444 = vmatprep.mubr.f32.mxu0 %v240_v3  ;;  %v1819_v58 = vpack.c.bf16 %v914_v57, %v913_v56 }
  0x84   :  { %445 = vmatmul.mubr.f32.gmra.mrb[30].mxu0 %v239_v59 }
  0x85   :  { %449 = vmatprep.mubr.f32.mxu0 %v242_v6  ;;  %v915_v6 = vld [vmem:[%s2423_s6 + $0x30] sm:$0xff] }
  0x88   :  { %450 = vmatmul.mubr.f32.gmra.mrb[32].mxu0 %v241_v60 }
  0x89   :  { %454 = vmatprep.mubr.f32.mxu0 %v244_v61  ;;  %v1823_v61 = vpack.c.bf16 %v916_v0, %v915_v6 }
  0x8c   :  { %455 = vmatmul.mubr.f32.gmra.mrb[34].mxu0 %v243_v62  ;;  %v917_v62 = vld [vmem:[%s2423_s6 + $0x40] sm:$0xff] }
  0x8d   :  { %459 = vmatprep.mubr.f32.mxu0 %v246_v63  ;;  %v918_v63 = vld [vmem:[%s2423_s6 + $0x48] sm:$0xff] }
  0x90   :  { %460 = vmatmul.mubr.f32.gmra.mrb[36].mxu0 %v245_v2  ;;  %v1827_v2 = vpack.c.bf16 %v918_v63, %v917_v62 }
  0x91   :  { %464 = vmatprep.mubr.f32.mxu0 %v248_v4 }
  0x94   :  { %465 = vmatmul.mubr.f32.gmra.mrb[38].mxu0 %v247_v7  ;;  %v920_v7 = vld [vmem:[%s2423_s6 + $0x58] sm:$0xff] }
  0x95   :  { %469 = vmatprep.mubr.f32.mxu0 %v250_v8  ;;  %v1831_v9 = vpack.c.bf16 %v920_v7, %v919_v5  ;;  %v2282_v5 = vld [vmem:[%s2424_s5] ss:$0 sm:$0xff] }
  0x98   :  { %470 = vmatmul.mubr.f32.gmra.mrb[40].mxu0 %v249_v10 }
  0x99   :  { %474 = vmatprep.mubr.f32.mxu0 %v252_v11  ;;  %v921_v11 = vld [vmem:[%s2423_s6 + $0x60] sm:$0xff] }
  0x9c   :  { %475 = vmatmul.mubr.f32.gmra.mrb[42].mxu0 %v251_v13 }
  0x9d   :  { %479 = vmatprep.mubr.f32.mxu0 %v254_v14  ;;  %v1835_v14 = vpack.c.bf16 %v922_v12, %v921_v11 }
  0xa0   :  { %480 = vmatmul.mubr.f32.gmra.mrb[44].mxu0 %v253_v19 }
  0xa1   :  { %484 = vmatprep.mubr.f32.mxu0 %v256_v20 }
  0xa4   :  { %485 = vmatmul.mubr.f32.gmra.mrb[46].mxu0 %v255_v22 }
  0xa5   :  { %489 = vmatprep.mubr.f32.mxu0 %v258_v23 }
  0xa8   :  { %490 = vmatmul.mubr.f32.gmra.mrb[48].mxu0 %v257_v25 }
  0xa9   :  { %494 = vmatprep.mubr.f32.mxu0 %v260_v26 }
  0xac   :  { %495 = vmatmul.mubr.f32.gmra.mrb[50].mxu0 %v259_v28 }
  0xad   :  { %499 = vmatprep.mubr.f32.mxu0 %v262_v29 }
  0xb0   :  { %500 = vmatmul.mubr.f32.gmra.mrb[52].mxu0 %v261_v31 }
  0xb1   :  { %504 = vmatprep.mubr.f32.mxu0 %v264_v32 }
  0xb4   :  { %505 = vmatmul.mubr.f32.gmra.mrb[54].mxu0 %v263_v34 }
  0xb5   :  { %509 = vmatprep.mubr.f32.mxu0 %v266_v35 }
  0xb8   :  { %510 = vmatmul.mubr.f32.gmra.mrb[56].mxu0 %v265_v37 }
  0xb9   :  { %514 = vmatprep.mubr.f32.mxu0 %v268_v38 }
  0xbc   :  { %515 = vmatmul.mubr.f32.gmra.mrb[58].mxu0 %v267_v40 }
  0xbd   :  { %519 = vmatprep.mubr.f32.mxu0 %v270_v41 }
  0xc0   :  { %520 = vmatmul.mubr.f32.gmra.mrb[60].mxu0 %v269_v43 }
  0xc1   :  { %524 = vmatprep.mubr.f32.mxu0 %v272_v45 }
  0xc4   :  { %525 = vmatmul.mubr.f32.gmra.mrb[62].mxu0 %v271_v46 }
 0x11b   :  { %v371_v50 = vpop.f32.mrb[0].mxu0 }
 0x11c   :  { %v373_v53 = vpop.f32.mrb[1].mxu0  ;;  %1603 = vmatprep.mubr.f32.mxu1 %v371_v50  ;;  %v924_v50 = vld [vmem:[%s2423_s6 + $0x78] sm:$0xff] }
 0x11f   :  { %v376_v55 = vpop.f32.mrb[2].mxu0 }
 0x120   :  { %v378_v3 = vpop.f32.mrb[3].mxu0  ;;  %1604 = vmatmul.mubr.f32.vlgmr.msra.gmra.mrb[0].mxu1 %v376_v55 }
 0x121   :  { %1814 = vmatpush3.bf16.msra.mxu1 %v1811_v49  ;;  %v923_v49 = vld [vmem:[%s2423_s6 + $0x70] sm:$0xff] }
 0x122   :  { %1816 = vmatprep.subr.bf16.mxu1 %v1815_v54  ;;  %v1839_v52 = vpack.c.bf16 %v924_v50, %v923_v49 }
 0x123   :  { %v381_v59 = vpop.f32.mrb[4].mxu0 }
 0x124   :  { %v383_v60 = vpop.f32.mrb[5].mxu0  ;;  %1606 = vmatprep.mubr.f32.mxu1 %v381_v59 }
 0x125   :  { %1818 = vmatpush3.bf16.msra.mxu1 %v1815_v54 }
 0x126   :  { %1820 = vmatprep.subr.bf16.mxu1 %v1819_v58 }
 0x127   :  { %v386_v44 = vpop.f32.mrb[6].mxu0 }
 0x128   :  { %v388_v1 = vpop.f32.mrb[7].mxu0  ;;  %1607 = vmatmul.mubr.f32.gmra.mrb[2].mxu1 %v386_v44 }
 0x129   :  { %1822 = vmatpush3.bf16.msra.mxu1 %v1819_v58 }
 0x12a   :  { %1824 = vmatprep.subr.bf16.mxu1 %v1823_v61 }
 0x12b   :  { %v391_v4 = vpop.f32.mrb[8].mxu0 }
 0x12c   :  { %v393_v8 = vpop.f32.mrb[9].mxu0  ;;  %1609 = vmatprep.mubr.f32.mxu1 %v391_v4 }
 0x12d   :  { %1826 = vmatpush3.bf16.msra.mxu1 %v1823_v61 }
 0x12e   :  { %1828 = vmatprep.subr.bf16.mxu1 %v1827_v2 }
 0x12f   :  { %v396_v10 = vpop.f32.mrb[10].mxu0 }
 0x130   :  { %v398_v13 = vpop.f32.mrb[11].mxu0  ;;  %1610 = vmatmul.mubr.f32.gmra.mrb[4].mxu1 %v396_v10 }
 0x131   :  { %1830 = vmatpush3.bf16.msra.mxu1 %v1827_v2 }
 0x132   :  { %1832 = vmatprep.subr.bf16.mxu1 %v1831_v9 }
 0x133   :  { %v401_v15 = vpop.f32.mrb[12].mxu0 }
 0x134   :  { %v403_v16 = vpop.f32.mrb[13].mxu0  ;;  %1612 = vmatprep.mubr.f32.mxu1 %v401_v15 }
 0x135   :  { %1834 = vmatpush3.bf16.msra.mxu1 %v1831_v9 }
 0x136   :  { %1836 = vmatprep.subr.bf16.mxu1 %v1835_v14 }
 0x137   :  { %v406_v17 = vpop.f32.mrb[14].mxu0 }
 0x138   :  { %v408_v18 = vpop.f32.mrb[15].mxu0  ;;  %1613 = vmatmul.mubr.f32.gmra.mrb[6].mxu1 %v406_v17 }
 0x139   :  { %1838 = vmatpush3.bf16.msra.mxu1 %v1835_v14 }
 0x13a   :  { %1840 = vmatprep.subr.bf16.mxu1 %v1839_v52 }
 0x13b   :  { %v411_v19 = vpop.f32.mrb[16].mxu0 }
 0x13c   :  { %v413_v20 = vpop.f32.mrb[17].mxu0  ;;  %1615 = vmatprep.mubr.f32.mxu1 %v411_v19 }
 0x13d   :  { %1842 = vmatpush3.bf16.msra.mxu1 %v1839_v52 }
 0x13f   :  { %v416_v21 = vpop.f32.mrb[18].mxu0 }
 0x140   :  { %v418_v22 = vpop.f32.mrb[19].mxu0  ;;  %1616 = vmatmul.mubr.f32.gmra.mrb[8].mxu1 %v416_v21 }
 0x143   :  { %v421_v23 = vpop.f32.mrb[20].mxu0 }
 0x144   :  { %v423_v24 = vpop.f32.mrb[21].mxu0  ;;  %1618 = vmatprep.mubr.f32.mxu1 %v421_v23 }
 0x147   :  { %v426_v25 = vpop.f32.mrb[22].mxu0 }
 0x148   :  { %v428_v26 = vpop.f32.mrb[23].mxu0  ;;  %1619 = vmatmul.mubr.f32.gmra.mrb[10].mxu1 %v426_v25 }
 0x14b   :  { %v431_v27 = vpop.f32.mrb[24].mxu0 }
 0x14c   :  { %v433_v28 = vpop.f32.mrb[25].mxu0  ;;  %1621 = vmatprep.mubr.f32.mxu1 %v431_v27 }
 0x14f   :  { %v436_v29 = vpop.f32.mrb[26].mxu0 }
 0x150   :  { %v438_v30 = vpop.f32.mrb[27].mxu0  ;;  %1622 = vmatmul.mubr.f32.gmra.mrb[12].mxu1 %v436_v29 }
 0x153   :  { %v441_v31 = vpop.f32.mrb[28].mxu0 }
 0x154   :  { %v443_v32 = vpop.f32.mrb[29].mxu0  ;;  %1624 = vmatprep.mubr.f32.mxu1 %v441_v31 }
 0x157   :  { %v446_v33 = vpop.f32.mrb[30].mxu0 }
 0x158   :  { %v448_v34 = vpop.f32.mrb[31].mxu0  ;;  %1625 = vmatmul.mubr.f32.gmra.mrb[14].mxu1 %v446_v33 }
 0x15b   :  { %v451_v35 = vpop.f32.mrb[32].mxu0 }
 0x15c   :  { %v453_v36 = vpop.f32.mrb[33].mxu0  ;;  %1627 = vmatprep.mubr.f32.mxu1 %v451_v35 }
 0x15f   :  { %v456_v37 = vpop.f32.mrb[34].mxu0 }
 0x160   :  { %v458_v38 = vpop.f32.mrb[35].mxu0  ;;  %1628 = vmatmul.mubr.f32.gmra.mrb[16].mxu1 %v456_v37 }
 0x163   :  { %v461_v39 = vpop.f32.mrb[36].mxu0 }
 0x164   :  { %v463_v40 = vpop.f32.mrb[37].mxu0  ;;  %1630 = vmatprep.mubr.f32.mxu1 %v461_v39 }
 0x167   :  { %v466_v41 = vpop.f32.mrb[38].mxu0 }
 0x168   :  { %v468_v42 = vpop.f32.mrb[39].mxu0  ;;  %1631 = vmatmul.mubr.f32.gmra.mrb[18].mxu1 %v466_v41 }
 0x16b   :  { %v471_v43 = vpop.f32.mrb[40].mxu0 }
 0x16c   :  { %v473_v45 = vpop.f32.mrb[41].mxu0  ;;  %1633 = vmatprep.mubr.f32.mxu1 %v471_v43 }
 0x16f   :  { %v476_v46 = vpop.f32.mrb[42].mxu0 }
 0x170   :  { %v478_v47 = vpop.f32.mrb[43].mxu0  ;;  %1634 = vmatmul.mubr.f32.gmra.mrb[20].mxu1 %v476_v46 }
 0x173   :  { %v481_v48 = vpop.f32.mrb[44].mxu0 }
 0x174   :  { %v483_v51 = vpop.f32.mrb[45].mxu0  ;;  %1636 = vmatprep.mubr.f32.mxu1 %v481_v48 }
 0x177   :  { %v486_v53 = vpop.f32.mrb[46].mxu0 }
 0x178   :  { %v488_v54 = vpop.f32.mrb[47].mxu0  ;;  %1637 = vmatmul.mubr.f32.gmra.mrb[22].mxu1 %v486_v53 }
 0x17b   :  { %v491_v55 = vpop.f32.mrb[48].mxu0 }
 0x17c   :  { %v493_v56 = vpop.f32.mrb[49].mxu0  ;;  %1639 = vmatprep.mubr.f32.mxu1 %v491_v55 }
 0x17f   :  { %v496_v57 = vpop.f32.mrb[50].mxu0 }
 0x180   :  { %v498_v3 = vpop.f32.mrb[51].mxu0  ;;  %1640 = vmatmul.mubr.f32.gmra.mrb[24].mxu1 %v496_v57 }
 0x183   :  { %v501_v58 = vpop.f32.mrb[52].mxu0 }
 0x184   :  { %v503_v59 = vpop.f32.mrb[53].mxu0  ;;  %1642 = vmatprep.mubr.f32.mxu1 %v501_v58 }
 0x187   :  { %v506_v6 = vpop.f32.mrb[54].mxu0 }
 0x188   :  { %v508_v0 = vpop.f32.mrb[55].mxu0  ;;  %1643 = vmatmul.mubr.f32.gmra.mrb[26].mxu1 %v506_v6 }
 0x18b   :  { %v511_v60 = vpop.f32.mrb[56].mxu0 }
 0x18c   :  { %v513_v61 = vpop.f32.mrb[57].mxu0  ;;  %1645 = vmatprep.mubr.f32.mxu1 %v511_v60 }
 0x18f   :  { %v516_v44 = vpop.f32.mrb[58].mxu0 }
 0x190   :  { %v518_v62 = vpop.f32.mrb[59].mxu0  ;;  %1646 = vmatmul.mubr.f32.gmra.mrb[28].mxu1 %v516_v44 }
 0x193   :  { %v521_v63 = vpop.f32.mrb[60].mxu0 }
 0x194   :  { %v523_v1 = vpop.f32.mrb[61].mxu0  ;;  %1648 = vmatprep.mubr.f32.mxu1 %v521_v63 }
 0x197   :  { %v526_v2 = vpop.f32.mrb[62].mxu0 }
 0x198   :  { %v528_v4 = vpop.f32.mrb[63].mxu0  ;;  %1649 = vmatmul.mubr.f32.gmra.mrb[30].mxu1 %v526_v2 }
 0x1f3   :  { %v1605_v7 = vpop.f32.mrb[0].mxu1 }
 0x1f4   :  { %v724_v8 = vadd.f32 %v1605_v7, %v2282_v5  ;;  %v718_v9 = vpop.f32.mrb[1].mxu1 }
 0x1f5   :  { %v719_v10 = vadd.f32 %v2282_v5, %v718_v9 }
 0x1f6   :  { %v878_v12 = vmax.f32 %v724_v8, 0.0 }
 0x1f7   :  { %v877_v11 = vmax.f32 %v719_v10, 0.0 }
 0x1f9   :  { %1683 = vmatprep.mubr.f32.mxu1 %v877_v11 }
 0x1fa   :  { %1684 = vmatmul.mubr.f32.vlgmr.msra.gmra.mrb[32].mxu1 %v878_v12 }
 0x1fb   :  { %v1608_v13 = vpop.f32.mrb[2].mxu1 }
 0x1fc   :  { %v734_v14 = vadd.f32 %v1608_v13, %v2282_v5  ;;  %v728_v15 = vpop.f32.mrb[3].mxu1 }
 0x1fd   :  { %v729_v16 = vadd.f32 %v2282_v5, %v728_v15 }
 0x1fe   :  { %v880_v18 = vmax.f32 %v734_v14, 0.0 }
 0x1ff   :  { %v879_v17 = vmax.f32 %v729_v16, 0.0 }
 0x201   :  { %1686 = vmatprep.mubr.f32.mxu1 %v879_v17  ;;  %v1846_v17 = vmov 0.0  }
 0x202   :  { %1687 = vmatmul.mubr.f32.gmra.mrb[34].mxu1 %v880_v18  ;;  %1324 = vst [vmem:[%s2425_s8 + $0x20] sm:$0xff] %v1846_v17  ;;  %1325 = vst [vmem:[%s2425_s8 + $0x28] sm:$0xff] %v1846_v17 }
 0x203   :  { %v1611_v19 = vpop.f32.mrb[4].mxu1  ;;  %1326 = vst [vmem:[%s2425_s8 + $0x30] sm:$0xff] %v1846_v17  ;;  %1327 = vst [vmem:[%s2425_s8 + $0x38] sm:$0xff] %v1846_v17 }
 0x204   :  { %v744_v20 = vadd.f32 %v1611_v19, %v2282_v5  ;;  %v738_v21 = vpop.f32.mrb[5].mxu1  ;;  %1328 = vst [vmem:[%s2425_s8 + $0x40] sm:$0xff] %v1846_v17  ;;  %1329 = vst [vmem:[%s2425_s8 + $0x48] sm:$0xff] %v1846_v17 }
 0x205   :  { %v739_v22 = vadd.f32 %v2282_v5, %v738_v21  ;;  %1330 = vst [vmem:[%s2425_s8 + $0x50] sm:$0xff] %v1846_v17  ;;  %1331 = vst [vmem:[%s2425_s8 + $0x58] sm:$0xff] %v1846_v17 }
 0x206   :  { %v882_v24 = vmax.f32 %v744_v20, 0.0  ;;  %1332 = vst [vmem:[%s2425_s8 + $0x60] sm:$0xff] %v1846_v17  ;;  %1333 = vst [vmem:[%s2425_s8 + $0x68] sm:$0xff] %v1846_v17 }
 0x207   :  { %v881_v23 = vmax.f32 %v739_v22, 0.0  ;;  %1334 = vst [vmem:[%s2425_s8 + $0x70] sm:$0xff] %v1846_v17  ;;  %1335 = vst [vmem:[%s2425_s8 + $0x78] sm:$0xff] %v1846_v17 }
 0x208   :  { %1336 = vst [vmem:[%s2425_s8 + $0x80] sm:$0xff] %v1846_v17  ;;  %1337 = vst [vmem:[%s2425_s8 + $0x88] sm:$0xff] %v1846_v17 }
 0x209   :  { %1689 = vmatprep.mubr.f32.mxu1 %v881_v23  ;;  %1338 = vst [vmem:[%s2425_s8 + $0x90] sm:$0xff] %v1846_v17  ;;  %1339 = vst [vmem:[%s2425_s8 + $0x98] sm:$0xff] %v1846_v17 }
 0x20a   :  { %1690 = vmatmul.mubr.f32.gmra.mrb[36].mxu1 %v882_v24  ;;  %1340 = vst [vmem:[%s2425_s8 + $0xa0] sm:$0xff] %v1846_v17  ;;  %1341 = vst [vmem:[%s2425_s8 + $0xa8] sm:$0xff] %v1846_v17 }
 0x20b   :  { %v1614_v25 = vpop.f32.mrb[6].mxu1  ;;  %1342 = vst [vmem:[%s2425_s8 + $0xb0] sm:$0xff] %v1846_v17  ;;  %1343 = vst [vmem:[%s2425_s8 + $0xb8] sm:$0xff] %v1846_v17 }
 0x20c   :  { %v754_v26 = vadd.f32 %v1614_v25, %v2282_v5  ;;  %v748_v27 = vpop.f32.mrb[7].mxu1  ;;  %1344 = vst [vmem:[%s2425_s8 + $0xc0] sm:$0xff] %v1846_v17  ;;  %1345 = vst [vmem:[%s2425_s8 + $0xc8] sm:$0xff] %v1846_v17 }
 0x20d   :  { %v749_v28 = vadd.f32 %v2282_v5, %v748_v27  ;;  %1346 = vst [vmem:[%s2425_s8 + $0xd0] sm:$0xff] %v1846_v17  ;;  %1347 = vst [vmem:[%s2425_s8 + $0xd8] sm:$0xff] %v1846_v17 }
 0x20e   :  { %v884_v30 = vmax.f32 %v754_v26, 0.0  ;;  %1348 = vst [vmem:[%s2425_s8 + $0xe0] sm:$0xff] %v1846_v17  ;;  %1349 = vst [vmem:[%s2425_s8 + $0xe8] sm:$0xff] %v1846_v17 }
 0x20f   :  { %v883_v29 = vmax.f32 %v749_v28, 0.0  ;;  %1350 = vst [vmem:[%s2425_s8 + $0xf0] sm:$0xff] %v1846_v17  ;;  %1351 = vst [vmem:[%s2425_s8 + $0xf8] sm:$0xff] %v1846_v17 }
 0x211   :  { %1692 = vmatprep.mubr.f32.mxu1 %v883_v29 }
 0x212   :  { %1693 = vmatmul.mubr.f32.gmra.mrb[38].mxu1 %v884_v30 }
 0x213   :  { %v1617_v31 = vpop.f32.mrb[8].mxu1 }
 0x214   :  { %v764_v32 = vadd.f32 %v1617_v31, %v2282_v5  ;;  %v758_v33 = vpop.f32.mrb[9].mxu1 }
 0x215   :  { %v759_v34 = vadd.f32 %v2282_v5, %v758_v33 }
 0x216   :  { %v886_v36 = vmax.f32 %v764_v32, 0.0 }
 0x217   :  { %v885_v35 = vmax.f32 %v759_v34, 0.0 }
 0x219   :  { %1695 = vmatprep.mubr.f32.mxu1 %v885_v35 }
 0x21a   :  { %1696 = vmatmul.mubr.f32.gmra.mrb[40].mxu1 %v886_v36 }
 0x21b   :  { %v1620_v37 = vpop.f32.mrb[10].mxu1 }
 0x21c   :  { %v774_v38 = vadd.f32 %v1620_v37, %v2282_v5  ;;  %v768_v39 = vpop.f32.mrb[11].mxu1 }
 0x21d   :  { %v769_v40 = vadd.f32 %v2282_v5, %v768_v39 }
 0x21e   :  { %v888_v42 = vmax.f32 %v774_v38, 0.0 }
 0x21f   :  { %v887_v41 = vmax.f32 %v769_v40, 0.0 }
 0x221   :  { %1698 = vmatprep.mubr.f32.mxu1 %v887_v41  ;;  %v1474_v41 = vld [vmem:[%s2426_s7] ss:$0 sm:$0xff] }
 0x222   :  { %1699 = vmatmul.mubr.f32.gmra.mrb[42].mxu1 %v888_v42 }
 0x223   :  { %v1623_v43 = vpop.f32.mrb[12].mxu1 }
 0x224   :  { %v784_v45 = vadd.f32 %v1623_v43, %v2282_v5  ;;  %v778_v46 = vpop.f32.mrb[13].mxu1 }
 0x225   :  { %v779_v47 = vadd.f32 %v2282_v5, %v778_v46 }
 0x226   :  { %v890_v49 = vmax.f32 %v784_v45, 0.0 }
 0x227   :  { %v889_v48 = vmax.f32 %v779_v47, 0.0 }
 0x229   :  { %1701 = vmatprep.mubr.f32.mxu1 %v889_v48 }
 0x22a   :  { %1702 = vmatmul.mubr.f32.gmra.mrb[44].mxu1 %v890_v49 }
 0x22b   :  { %v1626_v50 = vpop.f32.mrb[14].mxu1 }
 0x22c   :  { %v794_v51 = vadd.f32 %v1626_v50, %v2282_v5  ;;  %v788_v52 = vpop.f32.mrb[15].mxu1 }
 0x22d   :  { %v789_v53 = vadd.f32 %v2282_v5, %v788_v52 }
 0x22e   :  { %v892_v55 = vmax.f32 %v794_v51, 0.0 }
 0x22f   :  { %v891_v54 = vmax.f32 %v789_v53, 0.0 }
 0x231   :  { %1704 = vmatprep.mubr.f32.mxu1 %v891_v54 }
 0x232   :  { %1705 = vmatmul.mubr.f32.gmra.mrb[46].mxu1 %v892_v55 }
 0x233   :  { %v1629_v56 = vpop.f32.mrb[16].mxu1 }
 0x234   :  { %v804_v57 = vadd.f32 %v1629_v56, %v2282_v5  ;;  %v798_v3 = vpop.f32.mrb[17].mxu1 }
 0x235   :  { %v799_v58 = vadd.f32 %v2282_v5, %v798_v3 }
 0x236   :  { %v894_v6 = vmax.f32 %v804_v57, 0.0 }
 0x237   :  { %v893_v59 = vmax.f32 %v799_v58, 0.0 }
 0x239   :  { %1707 = vmatprep.mubr.f32.mxu1 %v893_v59 }
 0x23a   :  { %1708 = vmatmul.mubr.f32.gmra.mrb[48].mxu1 %v894_v6 }
 0x23b   :  { %v1632_v0 = vpop.f32.mrb[18].mxu1 }
 0x23c   :  { %v814_v60 = vadd.f32 %v1632_v0, %v2282_v5  ;;  %v808_v61 = vpop.f32.mrb[19].mxu1 }
 0x23d   :  { %v809_v44 = vadd.f32 %v2282_v5, %v808_v61 }
 0x23e   :  { %v896_v63 = vmax.f32 %v814_v60, 0.0 }
 0x23f   :  { %v895_v62 = vmax.f32 %v809_v44, 0.0 }
 0x241   :  { %1710 = vmatprep.mubr.f32.mxu1 %v895_v62 }
 0x242   :  { %1711 = vmatmul.mubr.f32.gmra.mrb[50].mxu1 %v896_v63 }
 0x243   :  { %v1635_v1 = vpop.f32.mrb[20].mxu1 }
 0x244   :  { %v824_v2 = vadd.f32 %v1635_v1, %v2282_v5  ;;  %v818_v4 = vpop.f32.mrb[21].mxu1 }
 0x245   :  { %v819_v7 = vadd.f32 %v2282_v5, %v818_v4 }
 0x246   :  { %v898_v9 = vmax.f32 %v824_v2, 0.0 }
 0x247   :  { %v897_v8 = vmax.f32 %v819_v7, 0.0 }
 0x249   :  { %1713 = vmatprep.mubr.f32.mxu1 %v897_v8 }
 0x24a   :  { %1714 = vmatmul.mubr.f32.gmra.mrb[52].mxu1 %v898_v9 }
 0x24b   :  { %v1638_v10 = vpop.f32.mrb[22].mxu1 }
 0x24c   :  { %v834_v11 = vadd.f32 %v1638_v10, %v2282_v5  ;;  %v828_v12 = vpop.f32.mrb[23].mxu1 }
 0x24d   :  { %v829_v13 = vadd.f32 %v2282_v5, %v828_v12 }
 0x24e   :  { %v900_v15 = vmax.f32 %v834_v11, 0.0 }
 0x24f   :  { %v899_v14 = vmax.f32 %v829_v13, 0.0 }
 0x251   :  { %1716 = vmatprep.mubr.f32.mxu1 %v899_v14 }
 0x252   :  { %1717 = vmatmul.mubr.f32.gmra.mrb[54].mxu1 %v900_v15 }
 0x253   :  { %v1641_v16 = vpop.f32.mrb[24].mxu1 }
 0x254   :  { %v844_v18 = vadd.f32 %v1641_v16, %v2282_v5  ;;  %v838_v19 = vpop.f32.mrb[25].mxu1 }
 0x255   :  { %v839_v20 = vadd.f32 %v2282_v5, %v838_v19 }
 0x256   :  { %v902_v22 = vmax.f32 %v844_v18, 0.0 }
 0x257   :  { %v901_v21 = vmax.f32 %v839_v20, 0.0 }
 0x259   :  { %1719 = vmatprep.mubr.f32.mxu1 %v901_v21 }
 0x25a   :  { %1720 = vmatmul.mubr.f32.gmra.mrb[56].mxu1 %v902_v22 }
 0x25b   :  { %v1644_v23 = vpop.f32.mrb[26].mxu1 }
 0x25c   :  { %v854_v24 = vadd.f32 %v1644_v23, %v2282_v5  ;;  %v848_v25 = vpop.f32.mrb[27].mxu1 }
 0x25d   :  { %v849_v26 = vadd.f32 %v2282_v5, %v848_v25 }
 0x25e   :  { %v904_v28 = vmax.f32 %v854_v24, 0.0 }
 0x25f   :  { %v903_v27 = vmax.f32 %v849_v26, 0.0 }
 0x261   :  { %1722 = vmatprep.mubr.f32.mxu1 %v903_v27 }
 0x262   :  { %1723 = vmatmul.mubr.f32.gmra.mrb[58].mxu1 %v904_v28 }
 0x263   :  { %v1647_v29 = vpop.f32.mrb[28].mxu1 }
 0x264   :  { %v864_v30 = vadd.f32 %v1647_v29, %v2282_v5  ;;  %v858_v31 = vpop.f32.mrb[29].mxu1 }
 0x265   :  { %v859_v32 = vadd.f32 %v2282_v5, %v858_v31 }
 0x266   :  { %v906_v34 = vmax.f32 %v864_v30, 0.0 }
 0x267   :  { %v905_v33 = vmax.f32 %v859_v32, 0.0 }
 0x269   :  { %1725 = vmatprep.mubr.f32.mxu1 %v905_v33 }
 0x26a   :  { %1726 = vmatmul.mubr.f32.gmra.mrb[60].mxu1 %v906_v34 }
 0x26b   :  { %v1650_v35 = vpop.f32.mrb[30].mxu1 }
 0x26c   :  { %v874_v36 = vadd.f32 %v1650_v35, %v2282_v5  ;;  %v868_v37 = vpop.f32.mrb[31].mxu1 }
 0x26d   :  { %v869_v38 = vadd.f32 %v2282_v5, %v868_v37 }
 0x26e   :  { %v908_v40 = vmax.f32 %v874_v36, 0.0 }
 0x26f   :  { %v907_v39 = vmax.f32 %v869_v38, 0.0 }
 0x271   :  { %1728 = vmatprep.mubr.f32.mxu1 %v907_v39 }
 0x272   :  { %1729 = vmatmul.mubr.f32.gmra.mrb[62].mxu1 %v908_v40 }
 0x2cd   :  { %v1685_v42 = vpop.f32.mrb[32].mxu1 }
 0x2ce   :  { %v1004_v43 = vadd.f32 %v1685_v42, %v1474_v41  ;;  %v998_v45 = vpop.f32.mrb[33].mxu1 }
 0x2cf   :  { %v999_v46 = vadd.f32 %v1474_v41, %v998_v45 }
 0x2d0   :  { %v1158_v47 = vmax.f32 %v1004_v43, 0.0 }
 0x2d1   :  { %v1157_v48 = vmax.f32 %v999_v46, 0.0 }
 0x2d2   :  { %1321 = vst [vmem:[%s2425_s8 + $0x8] sm:$0xff] %v1158_v47  ;;  %v1390_v49 = vmul.f32 %v1158_v47, %v1158_v47 }
 0x2d3   :  { %1320 = vst [vmem:[%s2425_s8] sm:$0xff] %v1157_v48  ;;  %v1352_v5 = vadd.f32 %v1158_v47, %v1157_v48  ;;  %v1389_v50 = vmul.f32 %v1157_v48, %v1157_v48 }
 0x2d5   :  { %v1421_v51 = vadd.f32 %v1390_v49, %v1389_v50  ;;  %v1688_v52 = vpop.f32.mrb[34].mxu1 }
 0x2d6   :  { %v1014_v53 = vadd.f32 %v1688_v52, %v1474_v41  ;;  %v1008_v54 = vpop.f32.mrb[35].mxu1 }
 0x2d7   :  { %v1009_v55 = vadd.f32 %v1474_v41, %v1008_v54 }
 0x2d8   :  { %v1160_v56 = vmax.f32 %v1014_v53, 0.0 }
 0x2d9   :  { %v1159_v57 = vmax.f32 %v1009_v55, 0.0 }
 0x2da   :  { %1323 = vst [vmem:[%s2425_s8 + $0x18] sm:$0xff] %v1160_v56  ;;  %v1392_v59 = vmul.f32 %v1160_v56, %v1160_v56 }
 0x2db   :  { %1322 = vst [vmem:[%s2425_s8 + $0x10] sm:$0xff] %v1159_v57  ;;  %v1353_v3 = vadd.f32 %v1352_v5, %v1159_v57  ;;  %v1391_v58 = vmul.f32 %v1159_v57, %v1159_v57 }
 0x2dd   :  { %v1354_v6 = vadd.f32 %v1353_v3, %v1160_v56  ;;  %v1422_v0 = vadd.f32 %v1421_v51, %v1391_v58  ;;  %v1691_v60 = vpop.f32.mrb[36].mxu1 }
 0x2de   :  { %v1018_v61 = vpop.f32.mrb[37].mxu1 }
 0x2df   :  { %v1383_v44 = vrot.slane %v1354_v6, 4  ;;  %v1423_v62 = vadd.f32 %v1422_v0, %v1392_v59 }
 0x2e1   :  { %v1384_v63 = vadd.f32 %v1383_v44, %v1354_v6  ;;  %v1452_v1 = vrot.slane %v1423_v62, 4 }
 0x2e3   :  { %v1385_v2 = vrot.slane %v1384_v63, 2  ;;  %v1453_v4 = vadd.f32 %v1452_v1, %v1423_v62 }
 0x2e5   :  { %v1386_v7 = vadd.f32 %v1385_v2, %v1384_v63  ;;  %v1454_v8 = vrot.slane %v1453_v4, 2  ;;  %v1694_v9 = vpop.f32.mrb[38].mxu1 }
 0x2e6   :  { %v1028_v10 = vpop.f32.mrb[39].mxu1 }
 0x2e7   :  { %v1387_v11 = vrot.slane %v1386_v7, 1  ;;  %v1455_v12 = vadd.f32 %v1454_v8, %v1453_v4 }
 0x2e9   :  { %v1456_v13 = vrot.slane %v1455_v12, 1  ;;  %v1388_v14 = vadd.f32 %v1387_v11, %v1386_v7 }
 0x2eb   :  { %v1457_v15 = vadd.f32 %v1456_v13, %v1455_v12 }
 0x2ed   :  { %v1459_v16 = vsel %vm1458_vm0, %v1388_v14, %v1457_v15  ;;  %v1697_v17 = vpop.f32.mrb[40].mxu1 }
 0x2ee   :  { %v1461_v18 = vsel %vm1460_vm1, %v1459_v16, 0.0  ;;  %v1038_v19 = vpop.f32.mrb[41].mxu1 }
 0x2ef   :  { %1462 = vst [vmem:[%s2427_s9] sm:$0xff] %v1461_v18 }
 0x2f5   :  { %v1700_v20 = vpop.f32.mrb[42].mxu1 }
 0x2f6   :  { %v1048_v21 = vpop.f32.mrb[43].mxu1 }
 0x2fd   :  { %v1703_v22 = vpop.f32.mrb[44].mxu1 }
 0x2fe   :  { %v1058_v23 = vpop.f32.mrb[45].mxu1 }
 0x305   :  { %v1706_v24 = vpop.f32.mrb[46].mxu1 }
 0x306   :  { %v1068_v25 = vpop.f32.mrb[47].mxu1 }
 0x30d   :  { %v1709_v26 = vpop.f32.mrb[48].mxu1 }
 0x30e   :  { %v1078_v27 = vpop.f32.mrb[49].mxu1 }
 0x315   :  { %v1712_v28 = vpop.f32.mrb[50].mxu1 }
 0x316   :  { %v1088_v29 = vpop.f32.mrb[51].mxu1 }
 0x31d   :  { %v1715_v30 = vpop.f32.mrb[52].mxu1 }
 0x31e   :  { %v1098_v31 = vpop.f32.mrb[53].mxu1 }
 0x325   :  { %v1718_v32 = vpop.f32.mrb[54].mxu1 }
 0x326   :  { %v1108_v33 = vpop.f32.mrb[55].mxu1 }
 0x32d   :  { %v1721_v34 = vpop.f32.mrb[56].mxu1 }
 0x32e   :  { %v1118_v35 = vpop.f32.mrb[57].mxu1 }
 0x335   :  { %v1724_v36 = vpop.f32.mrb[58].mxu1 }
 0x336   :  { %v1128_v37 = vpop.f32.mrb[59].mxu1 }
 0x33d   :  { %v1727_v38 = vpop.f32.mrb[60].mxu1 }
 0x33e   :  { %v1138_v39 = vpop.f32.mrb[61].mxu1 }
 0x345   :  { %v1730_v40 = vpop.f32.mrb[62].mxu1 }
 0x346   :  { %v1148_v41 = vpop.f32.mrb[63].mxu1 }

</bundles_post_ra>
